<compile_context>
chip_gen: v7x
topology: tpu7x:2x2x1
jax: 0.10.0
libtpu: 0.0.40
codegen_flags: <defaults>
</compile_context>

<pallas_src>
import functools

import jax
import jax.numpy as jnp
from jax import lax
from jax.experimental import pallas as pl
from jax.experimental.pallas import tpu as pltpu

LANE = 128  # lane-tile width; every packed operand/weight is one tile wide


def _place(v, offset, width=LANE):
    """Embed (B, w) value `v` at lane offset `offset` of a zero (B, width) row."""
    b, w = v.shape
    parts = []
    if offset:
        parts.append(jnp.zeros((b, offset), v.dtype))
    parts.append(v)
    right = width - offset - w
    if right:
        parts.append(jnp.zeros((b, right), v.dtype))
    return jnp.concatenate(parts, axis=-1)


def music_lstm_kernel(x_ref,    # (T, B, 128)  pre-packed [0 | 1 | x_t | 0] slab
                      w1_ref,   # (128, 4H) bf16  fused [Whh1 ; b1 ; Wih1]
                      w2_ref,   # (128, 4H) bf16  fused [Whh2 ; b2 ; Wih2]
                      wfc_ref,  # (128, 128) f32  fused [Wfc ; bfc] (cols padded)
                      out_ref,  # (B, 128)  lane-dense logits slab
                      *, hidden_size):
    T, B, _ = x_ref.shape
    H = hidden_size

    # Constant 1.0 at lane H: multiplies the folded-bias row of every packed
    # weight.  Computed once (hoisted out of the loop).
    bias_col = (lax.broadcasted_iota(jnp.int32, (B, LANE), 1) == H).astype(
        jnp.float32)

    def lstm_cell(operand_f32, w_ref, c):
        # One bf16 MXU push per cell: gates = [h | 1 | in] @ [Whh ; b ; Wih].
        # Weights are read from VMEM inside the cell (not hoisted to vregs).
        gates = jnp.dot(operand_f32.astype(jnp.bfloat16), w_ref[...],
                        preferred_element_type=jnp.float32)
        # Full-width transcendentals on the (B, 4H=128) gate vreg, then cheap
        # static lane slices.  PyTorch gate order: i, f, g, o.
        sig = jax.nn.sigmoid(gates)
        th = jnp.tanh(gates)
        i_g = sig[:, 0 * H:1 * H]
        f_g = sig[:, 1 * H:2 * H]
        g_g = th[:, 2 * H:3 * H]
        o_g = sig[:, 3 * H:4 * H]
        c_new = f_g * c + i_g * g_g
        h_new = o_g * jnp.tanh(c_new)
        return h_new, c_new

    h1 = jnp.zeros((B, H), jnp.float32)
    c1 = jnp.zeros((B, H), jnp.float32)
    h2 = jnp.zeros((B, H), jnp.float32)
    c2 = jnp.zeros((B, H), jnp.float32)

    # T (=8) is a compile-time constant: statically unrolled; all step-to-step
    # dependencies are pure vreg dependencies, so layer1(t+1) can overlap
    # layer2(t).
    for t in range(T):
        # Layer 1: x_ref[t] already carries [0 | 1 | x_t]; h1 lands at lanes
        # [0:H) with no lane shift (slab is zero there).
        op1 = x_ref[t] + _place(h1, 0)
        h1, c1 = lstm_cell(op1, w1_ref, c1)
        # Layer 2: [h2 | 1 | h1].  Only the h1 cross edge needs a lane
        # placement; the h2 recurrent backbone stays shift-free.
        op2 = _place(h2, 0) + bias_col + _place(h1, H + 1)
        h2, c2 = lstm_cell(op2, w2_ref, c2)

    # Dropout(0.3) is identity in eval mode -> no-op.
    # Final Linear on the last timestep; bfc is folded into row H of the packed
    # FC weight, output is a lane-dense (B, 128) store (sliced in the wrapper).
    out_ref[...] = jnp.dot(_place(h2, 0) + bias_col, wfc_ref[...],
                           preferred_element_type=jnp.float32)


def pack_lstm_layer(wih_t, whh_t, b, dtype=jnp.bfloat16):
    """Pack one LSTM layer into a single (128, 4H) fused gate weight.

    Row layout (contraction dim, matching the in-kernel operand [h | 1 | in]):
      rows [0:H)           -> Whh^T        (recurrent hidden, no lane shift)
      row  H               -> b_ih + b_hh  (picked up by the constant-1 lane)
      rows [H+1 : H+1+in)  -> Wih^T        (cell input)
      remaining rows       -> 0
    """
    in_dim, g = wih_t.shape
    h = whh_t.shape[0]
    assert h + 1 + in_dim <= LANE and g <= LANE
    w = jnp.zeros((LANE, g), jnp.float32)
    w = w.at[0:h, :].set(whh_t)
    w = w.at[h, :].set(jnp.reshape(b, (-1,)))
    w = w.at[h + 1:h + 1 + in_dim, :].set(wih_t)
    return w.astype(dtype)


def pack_fc(wfc_t, bfc):
    """Pack the final Linear into a (128, 128) weight with the bias in row H."""
    h, o = wfc_t.shape
    assert h + 1 <= LANE and o <= LANE
    w = jnp.zeros((LANE, LANE), jnp.float32)
    w = w.at[0:h, 0:o].set(wfc_t)
    w = w.at[h, 0:o].set(jnp.reshape(bfc, (-1,)))
    return w


def pack_inputs(x, hidden_size):
    """(B, T, I) -> (T, B, 128): lanes [H+1:H+1+I) = x_t, lane H = 1.0, rest 0."""
    B, T, I = x.shape
    H = hidden_size
    xt = jnp.transpose(x, (1, 0, 2))
    slab = jnp.zeros((T, B, LANE), jnp.float32)
    slab = slab.at[:, :, H + 1:H + 1 + I].set(xt)
    slab = slab.at[:, :, H].set(1.0)
    return slab


def music_lstm_forward(x, params):
    """x: (B, T, input_size) float32 -> (B, output_size) float32."""
    B, T, I = x.shape
    H = params["whh1_T"].shape[0]
    O = params["wfc_T"].shape[1]

    w1 = pack_lstm_layer(params["wih1_T"], params["whh1_T"], params["b1"])
    w2 = pack_lstm_layer(params["wih2_T"], params["whh2_T"], params["b2"])
    wfc = pack_fc(params["wfc_T"], params["bfc"])
    x_slab = pack_inputs(x, H)

    vmem = pltpu.MemorySpace.VMEM
    out_padded = pl.pallas_call(
        functools.partial(music_lstm_kernel, hidden_size=H),
        out_shape=jax.ShapeDtypeStruct((B, LANE), jnp.float32),
        in_specs=[pl.BlockSpec(memory_space=vmem)] * 4,
        out_specs=pl.BlockSpec(memory_space=vmem),
    )(x_slab, w1, w2, wfc)
    return out_padded[:, :O]


def music_lstm_ref(x, p):
    """Pure-JAX f32 reference (matches PyTorch LSTM(num_layers=2) + fc)."""
    B, T, I = x.shape
    H = p["whh1_T"].shape[0]

    def one(x_in, h, c, wih, whh, b):
        g = x_in @ wih + h @ whh + b
        i = jax.nn.sigmoid(g[:, :H])
        f = jax.nn.sigmoid(g[:, H:2 * H])
        gg = jnp.tanh(g[:, 2 * H:3 * H])
        o = jax.nn.sigmoid(g[:, 3 * H:])
        c_n = f * c + i * gg
        return o * jnp.tanh(c_n), c_n

    def cell(carry, x_t):
        h1, c1, h2, c2 = carry
        h1n, c1n = one(x_t, h1, c1, p["wih1_T"], p["whh1_T"], p["b1"])
        h2n, c2n = one(h1n, h2, c2, p["wih2_T"], p["whh2_T"], p["b2"])
        return (h1n, c1n, h2n, c2n), h2n

    init = tuple(jnp.zeros((B, H), jnp.float32) for _ in range(4))
    (h1, c1, h2, c2), _ = jax.lax.scan(cell, init, jnp.transpose(x, (1, 0, 2)))
    return h2 @ p["wfc_T"] + p["bfc"]


def init_params(key, input_size, hidden_size, output_size):
    ks = jax.random.split(key, 10)
    H, I, O = hidden_size, input_size, output_size
    s = 0.1
    # Weights stored pre-transposed (in_dim, out_dim); biases are b_ih + b_hh.
    return {
        "wih1_T": s * jax.random.normal(ks[0], (I, 4 * H), jnp.float32),
        "whh1_T": s * jax.random.normal(ks[1], (H, 4 * H), jnp.float32),
        "b1":     s * jax.random.normal(ks[2], (1, 4 * H), jnp.float32),
        "wih2_T": s * jax.random.normal(ks[3], (H, 4 * H), jnp.float32),
        "whh2_T": s * jax.random.normal(ks[4], (H, 4 * H), jnp.float32),
        "b2":     s * jax.random.normal(ks[5], (1, 4 * H), jnp.float32),
        "wfc_T":  s * jax.random.normal(ks[6], (H, O), jnp.float32),
        "bfc":    s * jax.random.normal(ks[7], (1, O), jnp.float32),
    }


if __name__ == "__main__":
    B, T, INPUT, HIDDEN, OUTPUT = 8, 8, 16, 32, 24

    key = jax.random.PRNGKey(0)
    k_x, k_p = jax.random.split(key)
    x = jax.random.normal(k_x, (B, T, INPUT), jnp.float32)
    params = init_params(k_p, INPUT, HIDDEN, OUTPUT)

    out = jax.block_until_ready(music_lstm_forward(x, params))
    ref = jax.block_until_ready(music_lstm_ref(x, params))

    assert out.shape == (B, OUTPUT)
    # Gate matmuls use bf16 MXU operands (f32 accumulation / state); the
    # recurrent bf16 rounding over T=8 steps stays well inside this tolerance.
    assert jnp.allclose(out, ref, atol=2e-2, rtol=2e-2), "mismatch vs reference"

    print("KERNEL_OK")
</pallas_src>

<mosaic_0001>
module attributes {stable_mosaic.version = 11 : i64} {
  func.func @music_lstm_kernel(%arg0: memref<8x8x128xf32, #tpu.memory_space<vmem>>, %arg1: memref<128x128xbf16, #tpu.memory_space<vmem>>, %arg2: memref<128x128xbf16, #tpu.memory_space<vmem>>, %arg3: memref<128x128xf32, #tpu.memory_space<vmem>>, %arg4: memref<8x128xf32, #tpu.memory_space<vmem>>) attributes {dimension_semantics = [], scalar_prefetch = 0 : i64, scratch_operands = 0 : i64, tpu.core_type = #tpu.core_type<tc>} {
    %0 = tpu.iota {dimensions = array<i32: 1>} : vector<8x128xi32>
    %c32_i32 = arith.constant 32 : i32
    %1 = vector.broadcast %c32_i32 : i32 to vector<8x128xi32>
    %2 = arith.cmpi eq, %0, %1 : vector<8x128xi32>
    %3 = arith.extui %2 : vector<8x128xi1> to vector<8x128xi32>
    %4 = arith.sitofp %3 : vector<8x128xi32> to vector<8x128xf32>
    %cst = arith.constant 0.000000e+00 : f32
    %5 = vector.broadcast %cst : f32 to vector<8x32xf32>
    %cst_0 = arith.constant 0.000000e+00 : f32
    %6 = vector.broadcast %cst_0 : f32 to vector<8x32xf32>
    %cst_1 = arith.constant 0.000000e+00 : f32
    %7 = vector.broadcast %cst_1 : f32 to vector<8x32xf32>
    %cst_2 = arith.constant 0.000000e+00 : f32
    %8 = vector.broadcast %cst_2 : f32 to vector<8x32xf32>
    %c0 = arith.constant 0 : index
    %c0_3 = arith.constant 0 : index
    %c0_4 = arith.constant 0 : index
    %9 = vector.load %arg0[%c0, %c0_3, %c0_4] : memref<8x8x128xf32, #tpu.memory_space<vmem>>, vector<1x8x128xf32>
    %10 = vector.shape_cast %9 : vector<1x8x128xf32> to vector<8x128xf32>
    %cst_5 = arith.constant 0.000000e+00 : f32
    %11 = vector.broadcast %cst_5 : f32 to vector<8x96xf32>
    %12 = tpu.concatenate %5, %11 in 1 : vector<8x32xf32>, vector<8x96xf32> -> vector<8x128xf32>
    %13 = arith.addf %10, %12 : vector<8x128xf32>
    %14 = arith.truncf %13 : vector<8x128xf32> to vector<8x128xbf16>
    %c0_6 = arith.constant 0 : index
    %c0_7 = arith.constant 0 : index
    %15 = vector.load %arg1[%c0_6, %c0_7] : memref<128x128xbf16, #tpu.memory_space<vmem>>, vector<128x128xbf16>
    %cst_8 = arith.constant dense<0.000000e+00> : vector<8x128xf32>
    %16 = tpu.matmul %14, %15, %cst_8 {dimension_numbers = #tpu.dot_dimension_numbers<[1], [0], [0], [1], [0, 0, 1, 1], [], []>} : vector<8x128xbf16>, vector<128x128xbf16>, vector<8x128xf32> -> vector<8x128xf32>
    %17 = arith.negf %16 : vector<8x128xf32>
    %18 = math.exp %17 : vector<8x128xf32>
    %cst_9 = arith.constant 1.000000e+00 : f32
    %19 = vector.broadcast %cst_9 : f32 to vector<8x128xf32>
    %20 = arith.addf %19, %18 : vector<8x128xf32>
    %21 = arith.divf %19, %20 : vector<8x128xf32>
    %22 = math.tanh %16 : vector<8x128xf32>
    %23 = vector.extract_strided_slice %21 {offsets = [0, 0], sizes = [8, 32], strides = [1, 1]} : vector<8x128xf32> to vector<8x32xf32>
    %24 = vector.extract_strided_slice %21 {offsets = [0, 32], sizes = [8, 32], strides = [1, 1]} : vector<8x128xf32> to vector<8x32xf32>
    %25 = vector.extract_strided_slice %22 {offsets = [0, 64], sizes = [8, 32], strides = [1, 1]} : vector<8x128xf32> to vector<8x32xf32>
    %26 = vector.extract_strided_slice %21 {offsets = [0, 96], sizes = [8, 32], strides = [1, 1]} : vector<8x128xf32> to vector<8x32xf32>
    %27 = arith.mulf %24, %6 : vector<8x32xf32>
    %28 = arith.mulf %23, %25 : vector<8x32xf32>
    %29 = arith.addf %27, %28 : vector<8x32xf32>
    %30 = math.tanh %29 : vector<8x32xf32>
    %31 = arith.mulf %26, %30 : vector<8x32xf32>
    %cst_10 = arith.constant 0.000000e+00 : f32
    %32 = vector.broadcast %cst_10 : f32 to vector<8x96xf32>
    %33 = tpu.concatenate %7, %32 in 1 : vector<8x32xf32>, vector<8x96xf32> -> vector<8x128xf32>
    %34 = arith.addf %33, %4 : vector<8x128xf32>
    %cst_11 = arith.constant 0.000000e+00 : f32
    %35 = vector.broadcast %cst_11 : f32 to vector<8x33xf32>
    %cst_12 = arith.constant 0.000000e+00 : f32
    %36 = vector.broadcast %cst_12 : f32 to vector<8x63xf32>
    %37 = tpu.concatenate %35, %31, %36 in 1 : vector<8x33xf32>, vector<8x32xf32>, vector<8x63xf32> -> vector<8x128xf32>
    %38 = arith.addf %34, %37 : vector<8x128xf32>
    %39 = arith.truncf %38 : vector<8x128xf32> to vector<8x128xbf16>
    %c0_13 = arith.constant 0 : index
    %c0_14 = arith.constant 0 : index
    %40 = vector.load %arg2[%c0_13, %c0_14] : memref<128x128xbf16, #tpu.memory_space<vmem>>, vector<128x128xbf16>
    %cst_15 = arith.constant dense<0.000000e+00> : vector<8x128xf32>
    %41 = tpu.matmul %39, %40, %cst_15 {dimension_numbers = #tpu.dot_dimension_numbers<[1], [0], [0], [1], [0, 0, 1, 1], [], []>} : vector<8x128xbf16>, vector<128x128xbf16>, vector<8x128xf32> -> vector<8x128xf32>
    %42 = arith.negf %41 : vector<8x128xf32>
    %43 = math.exp %42 : vector<8x128xf32>
    %cst_16 = arith.constant 1.000000e+00 : f32
    %44 = vector.broadcast %cst_16 : f32 to vector<8x128xf32>
    %45 = arith.addf %44, %43 : vector<8x128xf32>
    %46 = arith.divf %44, %45 : vector<8x128xf32>
    %47 = math.tanh %41 : vector<8x128xf32>
    %48 = vector.extract_strided_slice %46 {offsets = [0, 0], sizes = [8, 32], strides = [1, 1]} : vector<8x128xf32> to vector<8x32xf32>
    %49 = vector.extract_strided_slice %46 {offsets = [0, 32], sizes = [8, 32], strides = [1, 1]} : vector<8x128xf32> to vector<8x32xf32>
    %50 = vector.extract_strided_slice %47 {offsets = [0, 64], sizes = [8, 32], strides = [1, 1]} : vector<8x128xf32> to vector<8x32xf32>
    %51 = vector.extract_strided_slice %46 {offsets = [0, 96], sizes = [8, 32], strides = [1, 1]} : vector<8x128xf32> to vector<8x32xf32>
    %52 = arith.mulf %49, %8 : vector<8x32xf32>
    %53 = arith.mulf %48, %50 : vector<8x32xf32>
    %54 = arith.addf %52, %53 : vector<8x32xf32>
    %55 = math.tanh %54 : vector<8x32xf32>
    %56 = arith.mulf %51, %55 : vector<8x32xf32>
    %c1 = arith.constant 1 : index
    %c0_17 = arith.constant 0 : index
    %c0_18 = arith.constant 0 : index
    %57 = vector.load %arg0[%c1, %c0_17, %c0_18] : memref<8x8x128xf32, #tpu.memory_space<vmem>>, vector<1x8x128xf32>
    %58 = vector.shape_cast %57 : vector<1x8x128xf32> to vector<8x128xf32>
    %cst_19 = arith.constant 0.000000e+00 : f32
    %59 = vector.broadcast %cst_19 : f32 to vector<8x96xf32>
    %60 = tpu.concatenate %31, %59 in 1 : vector<8x32xf32>, vector<8x96xf32> -> vector<8x128xf32>
    %61 = arith.addf %58, %60 : vector<8x128xf32>
    %62 = arith.truncf %61 : vector<8x128xf32> to vector<8x128xbf16>
    %c0_20 = arith.constant 0 : index
    %c0_21 = arith.constant 0 : index
    %63 = vector.load %arg1[%c0_20, %c0_21] : memref<128x128xbf16, #tpu.memory_space<vmem>>, vector<128x128xbf16>
    %cst_22 = arith.constant dense<0.000000e+00> : vector<8x128xf32>
    %64 = tpu.matmul %62, %63, %cst_22 {dimension_numbers = #tpu.dot_dimension_numbers<[1], [0], [0], [1], [0, 0, 1, 1], [], []>} : vector<8x128xbf16>, vector<128x128xbf16>, vector<8x128xf32> -> vector<8x128xf32>
    %65 = arith.negf %64 : vector<8x128xf32>
    %66 = math.exp %65 : vector<8x128xf32>
    %cst_23 = arith.constant 1.000000e+00 : f32
    %67 = vector.broadcast %cst_23 : f32 to vector<8x128xf32>
    %68 = arith.addf %67, %66 : vector<8x128xf32>
    %69 = arith.divf %67, %68 : vector<8x128xf32>
    %70 = math.tanh %64 : vector<8x128xf32>
    %71 = vector.extract_strided_slice %69 {offsets = [0, 0], sizes = [8, 32], strides = [1, 1]} : vector<8x128xf32> to vector<8x32xf32>
    %72 = vector.extract_strided_slice %69 {offsets = [0, 32], sizes = [8, 32], strides = [1, 1]} : vector<8x128xf32> to vector<8x32xf32>
    %73 = vector.extract_strided_slice %70 {offsets = [0, 64], sizes = [8, 32], strides = [1, 1]} : vector<8x128xf32> to vector<8x32xf32>
    %74 = vector.extract_strided_slice %69 {offsets = [0, 96], sizes = [8, 32], strides = [1, 1]} : vector<8x128xf32> to vector<8x32xf32>
    %75 = arith.mulf %72, %29 : vector<8x32xf32>
    %76 = arith.mulf %71, %73 : vector<8x32xf32>
    %77 = arith.addf %75, %76 : vector<8x32xf32>
    %78 = math.tanh %77 : vector<8x32xf32>
    %79 = arith.mulf %74, %78 : vector<8x32xf32>
    %cst_24 = arith.constant 0.000000e+00 : f32
    %80 = vector.broadcast %cst_24 : f32 to vector<8x96xf32>
    %81 = tpu.concatenate %56, %80 in 1 : vector<8x32xf32>, vector<8x96xf32> -> vector<8x128xf32>
    %82 = arith.addf %81, %4 : vector<8x128xf32>
    %cst_25 = arith.constant 0.000000e+00 : f32
    %83 = vector.broadcast %cst_25 : f32 to vector<8x33xf32>
    %cst_26 = arith.constant 0.000000e+00 : f32
    %84 = vector.broadcast %cst_26 : f32 to vector<8x63xf32>
    %85 = tpu.concatenate %83, %79, %84 in 1 : vector<8x33xf32>, vector<8x32xf32>, vector<8x63xf32> -> vector<8x128xf32>
    %86 = arith.addf %82, %85 : vector<8x128xf32>
    %87 = arith.truncf %86 : vector<8x128xf32> to vector<8x128xbf16>
    %c0_27 = arith.constant 0 : index
    %c0_28 = arith.constant 0 : index
    %88 = vector.load %arg2[%c0_27, %c0_28] : memref<128x128xbf16, #tpu.memory_space<vmem>>, vector<128x128xbf16>
    %cst_29 = arith.constant dense<0.000000e+00> : vector<8x128xf32>
    %89 = tpu.matmul %87, %88, %cst_29 {dimension_numbers = #tpu.dot_dimension_numbers<[1], [0], [0], [1], [0, 0, 1, 1], [], []>} : vector<8x128xbf16>, vector<128x128xbf16>, vector<8x128xf32> -> vector<8x128xf32>
    %90 = arith.negf %89 : vector<8x128xf32>
    %91 = math.exp %90 : vector<8x128xf32>
    %cst_30 = arith.constant 1.000000e+00 : f32
    %92 = vector.broadcast %cst_30 : f32 to vector<8x128xf32>
    %93 = arith.addf %92, %91 : vector<8x128xf32>
    %94 = arith.divf %92, %93 : vector<8x128xf32>
    %95 = math.tanh %89 : vector<8x128xf32>
    %96 = vector.extract_strided_slice %94 {offsets = [0, 0], sizes = [8, 32], strides = [1, 1]} : vector<8x128xf32> to vector<8x32xf32>
    %97 = vector.extract_strided_slice %94 {offsets = [0, 32], sizes = [8, 32], strides = [1, 1]} : vector<8x128xf32> to vector<8x32xf32>
    %98 = vector.extract_strided_slice %95 {offsets = [0, 64], sizes = [8, 32], strides = [1, 1]} : vector<8x128xf32> to vector<8x32xf32>
    %99 = vector.extract_strided_slice %94 {offsets = [0, 96], sizes = [8, 32], strides = [1, 1]} : vector<8x128xf32> to vector<8x32xf32>
    %100 = arith.mulf %97, %54 : vector<8x32xf32>
    %101 = arith.mulf %96, %98 : vector<8x32xf32>
    %102 = arith.addf %100, %101 : vector<8x32xf32>
    %103 = math.tanh %102 : vector<8x32xf32>
    %104 = arith.mulf %99, %103 : vector<8x32xf32>
    %c2 = arith.constant 2 : index
    %c0_31 = arith.constant 0 : index
    %c0_32 = arith.constant 0 : index
    %105 = vector.load %arg0[%c2, %c0_31, %c0_32] : memref<8x8x128xf32, #tpu.memory_space<vmem>>, vector<1x8x128xf32>
    %106 = vector.shape_cast %105 : vector<1x8x128xf32> to vector<8x128xf32>
    %cst_33 = arith.constant 0.000000e+00 : f32
    %107 = vector.broadcast %cst_33 : f32 to vector<8x96xf32>
    %108 = tpu.concatenate %79, %107 in 1 : vector<8x32xf32>, vector<8x96xf32> -> vector<8x128xf32>
    %109 = arith.addf %106, %108 : vector<8x128xf32>
    %110 = arith.truncf %109 : vector<8x128xf32> to vector<8x128xbf16>
    %c0_34 = arith.constant 0 : index
    %c0_35 = arith.constant 0 : index
    %111 = vector.load %arg1[%c0_34, %c0_35] : memref<128x128xbf16, #tpu.memory_space<vmem>>, vector<128x128xbf16>
    %cst_36 = arith.constant dense<0.000000e+00> : vector<8x128xf32>
    %112 = tpu.matmul %110, %111, %cst_36 {dimension_numbers = #tpu.dot_dimension_numbers<[1], [0], [0], [1], [0, 0, 1, 1], [], []>} : vector<8x128xbf16>, vector<128x128xbf16>, vector<8x128xf32> -> vector<8x128xf32>
    %113 = arith.negf %112 : vector<8x128xf32>
    %114 = math.exp %113 : vector<8x128xf32>
    %cst_37 = arith.constant 1.000000e+00 : f32
    %115 = vector.broadcast %cst_37 : f32 to vector<8x128xf32>
    %116 = arith.addf %115, %114 : vector<8x128xf32>
    %117 = arith.divf %115, %116 : vector<8x128xf32>
    %118 = math.tanh %112 : vector<8x128xf32>
    %119 = vector.extract_strided_slice %117 {offsets = [0, 0], sizes = [8, 32], strides = [1, 1]} : vector<8x128xf32> to vector<8x32xf32>
    %120 = vector.extract_strided_slice %117 {offsets = [0, 32], sizes = [8, 32], strides = [1, 1]} : vector<8x128xf32> to vector<8x32xf32>
    %121 = vector.extract_strided_slice %118 {offsets = [0, 64], sizes = [8, 32], strides = [1, 1]} : vector<8x128xf32> to vector<8x32xf32>
    %122 = vector.extract_strided_slice %117 {offsets = [0, 96], sizes = [8, 32], strides = [1, 1]} : vector<8x128xf32> to vector<8x32xf32>
    %123 = arith.mulf %120, %77 : vector<8x32xf32>
    %124 = arith.mulf %119, %121 : vector<8x32xf32>
    %125 = arith.addf %123, %124 : vector<8x32xf32>
    %126 = math.tanh %125 : vector<8x32xf32>
    %127 = arith.mulf %122, %126 : vector<8x32xf32>
    %cst_38 = arith.constant 0.000000e+00 : f32
    %128 = vector.broadcast %cst_38 : f32 to vector<8x96xf32>
    %129 = tpu.concatenate %104, %128 in 1 : vector<8x32xf32>, vector<8x96xf32> -> vector<8x128xf32>
    %130 = arith.addf %129, %4 : vector<8x128xf32>
    %cst_39 = arith.constant 0.000000e+00 : f32
    %131 = vector.broadcast %cst_39 : f32 to vector<8x33xf32>
    %cst_40 = arith.constant 0.000000e+00 : f32
    %132 = vector.broadcast %cst_40 : f32 to vector<8x63xf32>
    %133 = tpu.concatenate %131, %127, %132 in 1 : vector<8x33xf32>, vector<8x32xf32>, vector<8x63xf32> -> vector<8x128xf32>
    %134 = arith.addf %130, %133 : vector<8x128xf32>
    %135 = arith.truncf %134 : vector<8x128xf32> to vector<8x128xbf16>
    %c0_41 = arith.constant 0 : index
    %c0_42 = arith.constant 0 : index
    %136 = vector.load %arg2[%c0_41, %c0_42] : memref<128x128xbf16, #tpu.memory_space<vmem>>, vector<128x128xbf16>
    %cst_43 = arith.constant dense<0.000000e+00> : vector<8x128xf32>
    %137 = tpu.matmul %135, %136, %cst_43 {dimension_numbers = #tpu.dot_dimension_numbers<[1], [0], [0], [1], [0, 0, 1, 1], [], []>} : vector<8x128xbf16>, vector<128x128xbf16>, vector<8x128xf32> -> vector<8x128xf32>
    %138 = arith.negf %137 : vector<8x128xf32>
    %139 = math.exp %138 : vector<8x128xf32>
    %cst_44 = arith.constant 1.000000e+00 : f32
    %140 = vector.broadcast %cst_44 : f32 to vector<8x128xf32>
    %141 = arith.addf %140, %139 : vector<8x128xf32>
    %142 = arith.divf %140, %141 : vector<8x128xf32>
    %143 = math.tanh %137 : vector<8x128xf32>
    %144 = vector.extract_strided_slice %142 {offsets = [0, 0], sizes = [8, 32], strides = [1, 1]} : vector<8x128xf32> to vector<8x32xf32>
    %145 = vector.extract_strided_slice %142 {offsets = [0, 32], sizes = [8, 32], strides = [1, 1]} : vector<8x128xf32> to vector<8x32xf32>
    %146 = vector.extract_strided_slice %143 {offsets = [0, 64], sizes = [8, 32], strides = [1, 1]} : vector<8x128xf32> to vector<8x32xf32>
    %147 = vector.extract_strided_slice %142 {offsets = [0, 96], sizes = [8, 32], strides = [1, 1]} : vector<8x128xf32> to vector<8x32xf32>
    %148 = arith.mulf %145, %102 : vector<8x32xf32>
    %149 = arith.mulf %144, %146 : vector<8x32xf32>
    %150 = arith.addf %148, %149 : vector<8x32xf32>
    %151 = math.tanh %150 : vector<8x32xf32>
    %152 = arith.mulf %147, %151 : vector<8x32xf32>
    %c3 = arith.constant 3 : index
    %c0_45 = arith.constant 0 : index
    %c0_46 = arith.constant 0 : index
    %153 = vector.load %arg0[%c3, %c0_45, %c0_46] : memref<8x8x128xf32, #tpu.memory_space<vmem>>, vector<1x8x128xf32>
    %154 = vector.shape_cast %153 : vector<1x8x128xf32> to vector<8x128xf32>
    %cst_47 = arith.constant 0.000000e+00 : f32
    %155 = vector.broadcast %cst_47 : f32 to vector<8x96xf32>
    %156 = tpu.concatenate %127, %155 in 1 : vector<8x32xf32>, vector<8x96xf32> -> vector<8x128xf32>
    %157 = arith.addf %154, %156 : vector<8x128xf32>
    %158 = arith.truncf %157 : vector<8x128xf32> to vector<8x128xbf16>
    %c0_48 = arith.constant 0 : index
    %c0_49 = arith.constant 0 : index
    %159 = vector.load %arg1[%c0_48, %c0_49] : memref<128x128xbf16, #tpu.memory_space<vmem>>, vector<128x128xbf16>
    %cst_50 = arith.constant dense<0.000000e+00> : vector<8x128xf32>
    %160 = tpu.matmul %158, %159, %cst_50 {dimension_numbers = #tpu.dot_dimension_numbers<[1], [0], [0], [1], [0, 0, 1, 1], [], []>} : vector<8x128xbf16>, vector<128x128xbf16>, vector<8x128xf32> -> vector<8x128xf32>
    %161 = arith.negf %160 : vector<8x128xf32>
    %162 = math.exp %161 : vector<8x128xf32>
    %cst_51 = arith.constant 1.000000e+00 : f32
    %163 = vector.broadcast %cst_51 : f32 to vector<8x128xf32>
    %164 = arith.addf %163, %162 : vector<8x128xf32>
    %165 = arith.divf %163, %164 : vector<8x128xf32>
    %166 = math.tanh %160 : vector<8x128xf32>
    %167 = vector.extract_strided_slice %165 {offsets = [0, 0], sizes = [8, 32], strides = [1, 1]} : vector<8x128xf32> to vector<8x32xf32>
    %168 = vector.extract_strided_slice %165 {offsets = [0, 32], sizes = [8, 32], strides = [1, 1]} : vector<8x128xf32> to vector<8x32xf32>
    %169 = vector.extract_strided_slice %166 {offsets = [0, 64], sizes = [8, 32], strides = [1, 1]} : vector<8x128xf32> to vector<8x32xf32>
    %170 = vector.extract_strided_slice %165 {offsets = [0, 96], sizes = [8, 32], strides = [1, 1]} : vector<8x128xf32> to vector<8x32xf32>
    %171 = arith.mulf %168, %125 : vector<8x32xf32>
    %172 = arith.mulf %167, %169 : vector<8x32xf32>
    %173 = arith.addf %171, %172 : vector<8x32xf32>
    %174 = math.tanh %173 : vector<8x32xf32>
    %175 = arith.mulf %170, %174 : vector<8x32xf32>
    %cst_52 = arith.constant 0.000000e+00 : f32
    %176 = vector.broadcast %cst_52 : f32 to vector<8x96xf32>
    %177 = tpu.concatenate %152, %176 in 1 : vector<8x32xf32>, vector<8x96xf32> -> vector<8x128xf32>
    %178 = arith.addf %177, %4 : vector<8x128xf32>
    %cst_53 = arith.constant 0.000000e+00 : f32
    %179 = vector.broadcast %cst_53 : f32 to vector<8x33xf32>
    %cst_54 = arith.constant 0.000000e+00 : f32
    %180 = vector.broadcast %cst_54 : f32 to vector<8x63xf32>
    %181 = tpu.concatenate %179, %175, %180 in 1 : vector<8x33xf32>, vector<8x32xf32>, vector<8x63xf32> -> vector<8x128xf32>
    %182 = arith.addf %178, %181 : vector<8x128xf32>
    %183 = arith.truncf %182 : vector<8x128xf32> to vector<8x128xbf16>
    %c0_55 = arith.constant 0 : index
    %c0_56 = arith.constant 0 : index
    %184 = vector.load %arg2[%c0_55, %c0_56] : memref<128x128xbf16, #tpu.memory_space<vmem>>, vector<128x128xbf16>
    %cst_57 = arith.constant dense<0.000000e+00> : vector<8x128xf32>
    %185 = tpu.matmul %183, %184, %cst_57 {dimension_numbers = #tpu.dot_dimension_numbers<[1], [0], [0], [1], [0, 0, 1, 1], [], []>} : vector<8x128xbf16>, vector<128x128xbf16>, vector<8x128xf32> -> vector<8x128xf32>
    %186 = arith.negf %185 : vector<8x128xf32>
    %187 = math.exp %186 : vector<8x128xf32>
    %cst_58 = arith.constant 1.000000e+00 : f32
    %188 = vector.broadcast %cst_58 : f32 to vector<8x128xf32>
    %189 = arith.addf %188, %187 : vector<8x128xf32>
    %190 = arith.divf %188, %189 : vector<8x128xf32>
    %191 = math.tanh %185 : vector<8x128xf32>
    %192 = vector.extract_strided_slice %190 {offsets = [0, 0], sizes = [8, 32], strides = [1, 1]} : vector<8x128xf32> to vector<8x32xf32>
    %193 = vector.extract_strided_slice %190 {offsets = [0, 32], sizes = [8, 32], strides = [1, 1]} : vector<8x128xf32> to vector<8x32xf32>
    %194 = vector.extract_strided_slice %191 {offsets = [0, 64], sizes = [8, 32], strides = [1, 1]} : vector<8x128xf32> to vector<8x32xf32>
    %195 = vector.extract_strided_slice %190 {offsets = [0, 96], sizes = [8, 32], strides = [1, 1]} : vector<8x128xf32> to vector<8x32xf32>
    %196 = arith.mulf %193, %150 : vector<8x32xf32>
    %197 = arith.mulf %192, %194 : vector<8x32xf32>
    %198 = arith.addf %196, %197 : vector<8x32xf32>
    %199 = math.tanh %198 : vector<8x32xf32>
    %200 = arith.mulf %195, %199 : vector<8x32xf32>
    %c4 = arith.constant 4 : index
    %c0_59 = arith.constant 0 : index
    %c0_60 = arith.constant 0 : index
    %201 = vector.load %arg0[%c4, %c0_59, %c0_60] : memref<8x8x128xf32, #tpu.memory_space<vmem>>, vector<1x8x128xf32>
    %202 = vector.shape_cast %201 : vector<1x8x128xf32> to vector<8x128xf32>
    %cst_61 = arith.constant 0.000000e+00 : f32
    %203 = vector.broadcast %cst_61 : f32 to vector<8x96xf32>
    %204 = tpu.concatenate %175, %203 in 1 : vector<8x32xf32>, vector<8x96xf32> -> vector<8x128xf32>
    %205 = arith.addf %202, %204 : vector<8x128xf32>
    %206 = arith.truncf %205 : vector<8x128xf32> to vector<8x128xbf16>
    %c0_62 = arith.constant 0 : index
    %c0_63 = arith.constant 0 : index
    %207 = vector.load %arg1[%c0_62, %c0_63] : memref<128x128xbf16, #tpu.memory_space<vmem>>, vector<128x128xbf16>
    %cst_64 = arith.constant dense<0.000000e+00> : vector<8x128xf32>
    %208 = tpu.matmul %206, %207, %cst_64 {dimension_numbers = #tpu.dot_dimension_numbers<[1], [0], [0], [1], [0, 0, 1, 1], [], []>} : vector<8x128xbf16>, vector<128x128xbf16>, vector<8x128xf32> -> vector<8x128xf32>
    %209 = arith.negf %208 : vector<8x128xf32>
    %210 = math.exp %209 : vector<8x128xf32>
    %cst_65 = arith.constant 1.000000e+00 : f32
    %211 = vector.broadcast %cst_65 : f32 to vector<8x128xf32>
    %212 = arith.addf %211, %210 : vector<8x128xf32>
    %213 = arith.divf %211, %212 : vector<8x128xf32>
    %214 = math.tanh %208 : vector<8x128xf32>
    %215 = vector.extract_strided_slice %213 {offsets = [0, 0], sizes = [8, 32], strides = [1, 1]} : vector<8x128xf32> to vector<8x32xf32>
    %216 = vector.extract_strided_slice %213 {offsets = [0, 32], sizes = [8, 32], strides = [1, 1]} : vector<8x128xf32> to vector<8x32xf32>
    %217 = vector.extract_strided_slice %214 {offsets = [0, 64], sizes = [8, 32], strides = [1, 1]} : vector<8x128xf32> to vector<8x32xf32>
    %218 = vector.extract_strided_slice %213 {offsets = [0, 96], sizes = [8, 32], strides = [1, 1]} : vector<8x128xf32> to vector<8x32xf32>
    %219 = arith.mulf %216, %173 : vector<8x32xf32>
    %220 = arith.mulf %215, %217 : vector<8x32xf32>
    %221 = arith.addf %219, %220 : vector<8x32xf32>
    %222 = math.tanh %221 : vector<8x32xf32>
    %223 = arith.mulf %218, %222 : vector<8x32xf32>
    %cst_66 = arith.constant 0.000000e+00 : f32
    %224 = vector.broadcast %cst_66 : f32 to vector<8x96xf32>
    %225 = tpu.concatenate %200, %224 in 1 : vector<8x32xf32>, vector<8x96xf32> -> vector<8x128xf32>
    %226 = arith.addf %225, %4 : vector<8x128xf32>
    %cst_67 = arith.constant 0.000000e+00 : f32
    %227 = vector.broadcast %cst_67 : f32 to vector<8x33xf32>
    %cst_68 = arith.constant 0.000000e+00 : f32
    %228 = vector.broadcast %cst_68 : f32 to vector<8x63xf32>
    %229 = tpu.concatenate %227, %223, %228 in 1 : vector<8x33xf32>, vector<8x32xf32>, vector<8x63xf32> -> vector<8x128xf32>
    %230 = arith.addf %226, %229 : vector<8x128xf32>
    %231 = arith.truncf %230 : vector<8x128xf32> to vector<8x128xbf16>
    %c0_69 = arith.constant 0 : index
    %c0_70 = arith.constant 0 : index
    %232 = vector.load %arg2[%c0_69, %c0_70] : memref<128x128xbf16, #tpu.memory_space<vmem>>, vector<128x128xbf16>
    %cst_71 = arith.constant dense<0.000000e+00> : vector<8x128xf32>
    %233 = tpu.matmul %231, %232, %cst_71 {dimension_numbers = #tpu.dot_dimension_numbers<[1], [0], [0], [1], [0, 0, 1, 1], [], []>} : vector<8x128xbf16>, vector<128x128xbf16>, vector<8x128xf32> -> vector<8x128xf32>
    %234 = arith.negf %233 : vector<8x128xf32>
    %235 = math.exp %234 : vector<8x128xf32>
    %cst_72 = arith.constant 1.000000e+00 : f32
    %236 = vector.broadcast %cst_72 : f32 to vector<8x128xf32>
    %237 = arith.addf %236, %235 : vector<8x128xf32>
    %238 = arith.divf %236, %237 : vector<8x128xf32>
    %239 = math.tanh %233 : vector<8x128xf32>
    %240 = vector.extract_strided_slice %238 {offsets = [0, 0], sizes = [8, 32], strides = [1, 1]} : vector<8x128xf32> to vector<8x32xf32>
    %241 = vector.extract_strided_slice %238 {offsets = [0, 32], sizes = [8, 32], strides = [1, 1]} : vector<8x128xf32> to vector<8x32xf32>
    %242 = vector.extract_strided_slice %239 {offsets = [0, 64], sizes = [8, 32], strides = [1, 1]} : vector<8x128xf32> to vector<8x32xf32>
    %243 = vector.extract_strided_slice %238 {offsets = [0, 96], sizes = [8, 32], strides = [1, 1]} : vector<8x128xf32> to vector<8x32xf32>
    %244 = arith.mulf %241, %198 : vector<8x32xf32>
    %245 = arith.mulf %240, %242 : vector<8x32xf32>
    %246 = arith.addf %244, %245 : vector<8x32xf32>
    %247 = math.tanh %246 : vector<8x32xf32>
    %248 = arith.mulf %243, %247 : vector<8x32xf32>
    %c5 = arith.constant 5 : index
    %c0_73 = arith.constant 0 : index
    %c0_74 = arith.constant 0 : index
    %249 = vector.load %arg0[%c5, %c0_73, %c0_74] : memref<8x8x128xf32, #tpu.memory_space<vmem>>, vector<1x8x128xf32>
    %250 = vector.shape_cast %249 : vector<1x8x128xf32> to vector<8x128xf32>
    %cst_75 = arith.constant 0.000000e+00 : f32
    %251 = vector.broadcast %cst_75 : f32 to vector<8x96xf32>
    %252 = tpu.concatenate %223, %251 in 1 : vector<8x32xf32>, vector<8x96xf32> -> vector<8x128xf32>
    %253 = arith.addf %250, %252 : vector<8x128xf32>
    %254 = arith.truncf %253 : vector<8x128xf32> to vector<8x128xbf16>
    %c0_76 = arith.constant 0 : index
    %c0_77 = arith.constant 0 : index
    %255 = vector.load %arg1[%c0_76, %c0_77] : memref<128x128xbf16, #tpu.memory_space<vmem>>, vector<128x128xbf16>
    %cst_78 = arith.constant dense<0.000000e+00> : vector<8x128xf32>
    %256 = tpu.matmul %254, %255, %cst_78 {dimension_numbers = #tpu.dot_dimension_numbers<[1], [0], [0], [1], [0, 0, 1, 1], [], []>} : vector<8x128xbf16>, vector<128x128xbf16>, vector<8x128xf32> -> vector<8x128xf32>
    %257 = arith.negf %256 : vector<8x128xf32>
    %258 = math.exp %257 : vector<8x128xf32>
    %cst_79 = arith.constant 1.000000e+00 : f32
    %259 = vector.broadcast %cst_79 : f32 to vector<8x128xf32>
    %260 = arith.addf %259, %258 : vector<8x128xf32>
    %261 = arith.divf %259, %260 : vector<8x128xf32>
    %262 = math.tanh %256 : vector<8x128xf32>
    %263 = vector.extract_strided_slice %261 {offsets = [0, 0], sizes = [8, 32], strides = [1, 1]} : vector<8x128xf32> to vector<8x32xf32>
    %264 = vector.extract_strided_slice %261 {offsets = [0, 32], sizes = [8, 32], strides = [1, 1]} : vector<8x128xf32> to vector<8x32xf32>
    %265 = vector.extract_strided_slice %262 {offsets = [0, 64], sizes = [8, 32], strides = [1, 1]} : vector<8x128xf32> to vector<8x32xf32>
    %266 = vector.extract_strided_slice %261 {offsets = [0, 96], sizes = [8, 32], strides = [1, 1]} : vector<8x128xf32> to vector<8x32xf32>
    %267 = arith.mulf %264, %221 : vector<8x32xf32>
    %268 = arith.mulf %263, %265 : vector<8x32xf32>
    %269 = arith.addf %267, %268 : vector<8x32xf32>
    %270 = math.tanh %269 : vector<8x32xf32>
    %271 = arith.mulf %266, %270 : vector<8x32xf32>
    %cst_80 = arith.constant 0.000000e+00 : f32
    %272 = vector.broadcast %cst_80 : f32 to vector<8x96xf32>
    %273 = tpu.concatenate %248, %272 in 1 : vector<8x32xf32>, vector<8x96xf32> -> vector<8x128xf32>
    %274 = arith.addf %273, %4 : vector<8x128xf32>
    %cst_81 = arith.constant 0.000000e+00 : f32
    %275 = vector.broadcast %cst_81 : f32 to vector<8x33xf32>
    %cst_82 = arith.constant 0.000000e+00 : f32
    %276 = vector.broadcast %cst_82 : f32 to vector<8x63xf32>
    %277 = tpu.concatenate %275, %271, %276 in 1 : vector<8x33xf32>, vector<8x32xf32>, vector<8x63xf32> -> vector<8x128xf32>
    %278 = arith.addf %274, %277 : vector<8x128xf32>
    %279 = arith.truncf %278 : vector<8x128xf32> to vector<8x128xbf16>
    %c0_83 = arith.constant 0 : index
    %c0_84 = arith.constant 0 : index
    %280 = vector.load %arg2[%c0_83, %c0_84] : memref<128x128xbf16, #tpu.memory_space<vmem>>, vector<128x128xbf16>
    %cst_85 = arith.constant dense<0.000000e+00> : vector<8x128xf32>
    %281 = tpu.matmul %279, %280, %cst_85 {dimension_numbers = #tpu.dot_dimension_numbers<[1], [0], [0], [1], [0, 0, 1, 1], [], []>} : vector<8x128xbf16>, vector<128x128xbf16>, vector<8x128xf32> -> vector<8x128xf32>
    %282 = arith.negf %281 : vector<8x128xf32>
    %283 = math.exp %282 : vector<8x128xf32>
    %cst_86 = arith.constant 1.000000e+00 : f32
    %284 = vector.broadcast %cst_86 : f32 to vector<8x128xf32>
    %285 = arith.addf %284, %283 : vector<8x128xf32>
    %286 = arith.divf %284, %285 : vector<8x128xf32>
    %287 = math.tanh %281 : vector<8x128xf32>
    %288 = vector.extract_strided_slice %286 {offsets = [0, 0], sizes = [8, 32], strides = [1, 1]} : vector<8x128xf32> to vector<8x32xf32>
    %289 = vector.extract_strided_slice %286 {offsets = [0, 32], sizes = [8, 32], strides = [1, 1]} : vector<8x128xf32> to vector<8x32xf32>
    %290 = vector.extract_strided_slice %287 {offsets = [0, 64], sizes = [8, 32], strides = [1, 1]} : vector<8x128xf32> to vector<8x32xf32>
    %291 = vector.extract_strided_slice %286 {offsets = [0, 96], sizes = [8, 32], strides = [1, 1]} : vector<8x128xf32> to vector<8x32xf32>
    %292 = arith.mulf %289, %246 : vector<8x32xf32>
    %293 = arith.mulf %288, %290 : vector<8x32xf32>
    %294 = arith.addf %292, %293 : vector<8x32xf32>
    %295 = math.tanh %294 : vector<8x32xf32>
    %296 = arith.mulf %291, %295 : vector<8x32xf32>
    %c6 = arith.constant 6 : index
    %c0_87 = arith.constant 0 : index
    %c0_88 = arith.constant 0 : index
    %297 = vector.load %arg0[%c6, %c0_87, %c0_88] : memref<8x8x128xf32, #tpu.memory_space<vmem>>, vector<1x8x128xf32>
    %298 = vector.shape_cast %297 : vector<1x8x128xf32> to vector<8x128xf32>
    %cst_89 = arith.constant 0.000000e+00 : f32
    %299 = vector.broadcast %cst_89 : f32 to vector<8x96xf32>
    %300 = tpu.concatenate %271, %299 in 1 : vector<8x32xf32>, vector<8x96xf32> -> vector<8x128xf32>
    %301 = arith.addf %298, %300 : vector<8x128xf32>
    %302 = arith.truncf %301 : vector<8x128xf32> to vector<8x128xbf16>
    %c0_90 = arith.constant 0 : index
    %c0_91 = arith.constant 0 : index
    %303 = vector.load %arg1[%c0_90, %c0_91] : memref<128x128xbf16, #tpu.memory_space<vmem>>, vector<128x128xbf16>
    %cst_92 = arith.constant dense<0.000000e+00> : vector<8x128xf32>
    %304 = tpu.matmul %302, %303, %cst_92 {dimension_numbers = #tpu.dot_dimension_numbers<[1], [0], [0], [1], [0, 0, 1, 1], [], []>} : vector<8x128xbf16>, vector<128x128xbf16>, vector<8x128xf32> -> vector<8x128xf32>
    %305 = arith.negf %304 : vector<8x128xf32>
    %306 = math.exp %305 : vector<8x128xf32>
    %cst_93 = arith.constant 1.000000e+00 : f32
    %307 = vector.broadcast %cst_93 : f32 to vector<8x128xf32>
    %308 = arith.addf %307, %306 : vector<8x128xf32>
    %309 = arith.divf %307, %308 : vector<8x128xf32>
    %310 = math.tanh %304 : vector<8x128xf32>
    %311 = vector.extract_strided_slice %309 {offsets = [0, 0], sizes = [8, 32], strides = [1, 1]} : vector<8x128xf32> to vector<8x32xf32>
    %312 = vector.extract_strided_slice %309 {offsets = [0, 32], sizes = [8, 32], strides = [1, 1]} : vector<8x128xf32> to vector<8x32xf32>
    %313 = vector.extract_strided_slice %310 {offsets = [0, 64], sizes = [8, 32], strides = [1, 1]} : vector<8x128xf32> to vector<8x32xf32>
    %314 = vector.extract_strided_slice %309 {offsets = [0, 96], sizes = [8, 32], strides = [1, 1]} : vector<8x128xf32> to vector<8x32xf32>
    %315 = arith.mulf %312, %269 : vector<8x32xf32>
    %316 = arith.mulf %311, %313 : vector<8x32xf32>
    %317 = arith.addf %315, %316 : vector<8x32xf32>
    %318 = math.tanh %317 : vector<8x32xf32>
    %319 = arith.mulf %314, %318 : vector<8x32xf32>
    %cst_94 = arith.constant 0.000000e+00 : f32
    %320 = vector.broadcast %cst_94 : f32 to vector<8x96xf32>
    %321 = tpu.concatenate %296, %320 in 1 : vector<8x32xf32>, vector<8x96xf32> -> vector<8x128xf32>
    %322 = arith.addf %321, %4 : vector<8x128xf32>
    %cst_95 = arith.constant 0.000000e+00 : f32
    %323 = vector.broadcast %cst_95 : f32 to vector<8x33xf32>
    %cst_96 = arith.constant 0.000000e+00 : f32
    %324 = vector.broadcast %cst_96 : f32 to vector<8x63xf32>
    %325 = tpu.concatenate %323, %319, %324 in 1 : vector<8x33xf32>, vector<8x32xf32>, vector<8x63xf32> -> vector<8x128xf32>
    %326 = arith.addf %322, %325 : vector<8x128xf32>
    %327 = arith.truncf %326 : vector<8x128xf32> to vector<8x128xbf16>
    %c0_97 = arith.constant 0 : index
    %c0_98 = arith.constant 0 : index
    %328 = vector.load %arg2[%c0_97, %c0_98] : memref<128x128xbf16, #tpu.memory_space<vmem>>, vector<128x128xbf16>
    %cst_99 = arith.constant dense<0.000000e+00> : vector<8x128xf32>
    %329 = tpu.matmul %327, %328, %cst_99 {dimension_numbers = #tpu.dot_dimension_numbers<[1], [0], [0], [1], [0, 0, 1, 1], [], []>} : vector<8x128xbf16>, vector<128x128xbf16>, vector<8x128xf32> -> vector<8x128xf32>
    %330 = arith.negf %329 : vector<8x128xf32>
    %331 = math.exp %330 : vector<8x128xf32>
    %cst_100 = arith.constant 1.000000e+00 : f32
    %332 = vector.broadcast %cst_100 : f32 to vector<8x128xf32>
    %333 = arith.addf %332, %331 : vector<8x128xf32>
    %334 = arith.divf %332, %333 : vector<8x128xf32>
    %335 = math.tanh %329 : vector<8x128xf32>
    %336 = vector.extract_strided_slice %334 {offsets = [0, 0], sizes = [8, 32], strides = [1, 1]} : vector<8x128xf32> to vector<8x32xf32>
    %337 = vector.extract_strided_slice %334 {offsets = [0, 32], sizes = [8, 32], strides = [1, 1]} : vector<8x128xf32> to vector<8x32xf32>
    %338 = vector.extract_strided_slice %335 {offsets = [0, 64], sizes = [8, 32], strides = [1, 1]} : vector<8x128xf32> to vector<8x32xf32>
    %339 = vector.extract_strided_slice %334 {offsets = [0, 96], sizes = [8, 32], strides = [1, 1]} : vector<8x128xf32> to vector<8x32xf32>
    %340 = arith.mulf %337, %294 : vector<8x32xf32>
    %341 = arith.mulf %336, %338 : vector<8x32xf32>
    %342 = arith.addf %340, %341 : vector<8x32xf32>
    %343 = math.tanh %342 : vector<8x32xf32>
    %344 = arith.mulf %339, %343 : vector<8x32xf32>
    %c7 = arith.constant 7 : index
    %c0_101 = arith.constant 0 : index
    %c0_102 = arith.constant 0 : index
    %345 = vector.load %arg0[%c7, %c0_101, %c0_102] : memref<8x8x128xf32, #tpu.memory_space<vmem>>, vector<1x8x128xf32>
    %346 = vector.shape_cast %345 : vector<1x8x128xf32> to vector<8x128xf32>
    %cst_103 = arith.constant 0.000000e+00 : f32
    %347 = vector.broadcast %cst_103 : f32 to vector<8x96xf32>
    %348 = tpu.concatenate %319, %347 in 1 : vector<8x32xf32>, vector<8x96xf32> -> vector<8x128xf32>
    %349 = arith.addf %346, %348 : vector<8x128xf32>
    %350 = arith.truncf %349 : vector<8x128xf32> to vector<8x128xbf16>
    %c0_104 = arith.constant 0 : index
    %c0_105 = arith.constant 0 : index
    %351 = vector.load %arg1[%c0_104, %c0_105] : memref<128x128xbf16, #tpu.memory_space<vmem>>, vector<128x128xbf16>
    %cst_106 = arith.constant dense<0.000000e+00> : vector<8x128xf32>
    %352 = tpu.matmul %350, %351, %cst_106 {dimension_numbers = #tpu.dot_dimension_numbers<[1], [0], [0], [1], [0, 0, 1, 1], [], []>} : vector<8x128xbf16>, vector<128x128xbf16>, vector<8x128xf32> -> vector<8x128xf32>
    %353 = arith.negf %352 : vector<8x128xf32>
    %354 = math.exp %353 : vector<8x128xf32>
    %cst_107 = arith.constant 1.000000e+00 : f32
    %355 = vector.broadcast %cst_107 : f32 to vector<8x128xf32>
    %356 = arith.addf %355, %354 : vector<8x128xf32>
    %357 = arith.divf %355, %356 : vector<8x128xf32>
    %358 = math.tanh %352 : vector<8x128xf32>
    %359 = vector.extract_strided_slice %357 {offsets = [0, 0], sizes = [8, 32], strides = [1, 1]} : vector<8x128xf32> to vector<8x32xf32>
    %360 = vector.extract_strided_slice %357 {offsets = [0, 32], sizes = [8, 32], strides = [1, 1]} : vector<8x128xf32> to vector<8x32xf32>
    %361 = vector.extract_strided_slice %358 {offsets = [0, 64], sizes = [8, 32], strides = [1, 1]} : vector<8x128xf32> to vector<8x32xf32>
    %362 = vector.extract_strided_slice %357 {offsets = [0, 96], sizes = [8, 32], strides = [1, 1]} : vector<8x128xf32> to vector<8x32xf32>
    %363 = arith.mulf %360, %317 : vector<8x32xf32>
    %364 = arith.mulf %359, %361 : vector<8x32xf32>
    %365 = arith.addf %363, %364 : vector<8x32xf32>
    %366 = math.tanh %365 : vector<8x32xf32>
    %367 = arith.mulf %362, %366 : vector<8x32xf32>
    %cst_108 = arith.constant 0.000000e+00 : f32
    %368 = vector.broadcast %cst_108 : f32 to vector<8x96xf32>
    %369 = tpu.concatenate %344, %368 in 1 : vector<8x32xf32>, vector<8x96xf32> -> vector<8x128xf32>
    %370 = arith.addf %369, %4 : vector<8x128xf32>
    %cst_109 = arith.constant 0.000000e+00 : f32
    %371 = vector.broadcast %cst_109 : f32 to vector<8x33xf32>
    %cst_110 = arith.constant 0.000000e+00 : f32
    %372 = vector.broadcast %cst_110 : f32 to vector<8x63xf32>
    %373 = tpu.concatenate %371, %367, %372 in 1 : vector<8x33xf32>, vector<8x32xf32>, vector<8x63xf32> -> vector<8x128xf32>
    %374 = arith.addf %370, %373 : vector<8x128xf32>
    %375 = arith.truncf %374 : vector<8x128xf32> to vector<8x128xbf16>
    %c0_111 = arith.constant 0 : index
    %c0_112 = arith.constant 0 : index
    %376 = vector.load %arg2[%c0_111, %c0_112] : memref<128x128xbf16, #tpu.memory_space<vmem>>, vector<128x128xbf16>
    %cst_113 = arith.constant dense<0.000000e+00> : vector<8x128xf32>
    %377 = tpu.matmul %375, %376, %cst_113 {dimension_numbers = #tpu.dot_dimension_numbers<[1], [0], [0], [1], [0, 0, 1, 1], [], []>} : vector<8x128xbf16>, vector<128x128xbf16>, vector<8x128xf32> -> vector<8x128xf32>
    %378 = arith.negf %377 : vector<8x128xf32>
    %379 = math.exp %378 : vector<8x128xf32>
    %cst_114 = arith.constant 1.000000e+00 : f32
    %380 = vector.broadcast %cst_114 : f32 to vector<8x128xf32>
    %381 = arith.addf %380, %379 : vector<8x128xf32>
    %382 = arith.divf %380, %381 : vector<8x128xf32>
    %383 = math.tanh %377 : vector<8x128xf32>
    %384 = vector.extract_strided_slice %382 {offsets = [0, 0], sizes = [8, 32], strides = [1, 1]} : vector<8x128xf32> to vector<8x32xf32>
    %385 = vector.extract_strided_slice %382 {offsets = [0, 32], sizes = [8, 32], strides = [1, 1]} : vector<8x128xf32> to vector<8x32xf32>
    %386 = vector.extract_strided_slice %383 {offsets = [0, 64], sizes = [8, 32], strides = [1, 1]} : vector<8x128xf32> to vector<8x32xf32>
    %387 = vector.extract_strided_slice %382 {offsets = [0, 96], sizes = [8, 32], strides = [1, 1]} : vector<8x128xf32> to vector<8x32xf32>
    %388 = arith.mulf %385, %342 : vector<8x32xf32>
    %389 = arith.mulf %384, %386 : vector<8x32xf32>
    %390 = arith.addf %388, %389 : vector<8x32xf32>
    %391 = math.tanh %390 : vector<8x32xf32>
    %392 = arith.mulf %387, %391 : vector<8x32xf32>
    %cst_115 = arith.constant 0.000000e+00 : f32
    %393 = vector.broadcast %cst_115 : f32 to vector<8x96xf32>
    %394 = tpu.concatenate %392, %393 in 1 : vector<8x32xf32>, vector<8x96xf32> -> vector<8x128xf32>
    %395 = arith.addf %394, %4 : vector<8x128xf32>
    %c0_116 = arith.constant 0 : index
    %c0_117 = arith.constant 0 : index
    %396 = vector.load %arg3[%c0_116, %c0_117] : memref<128x128xf32, #tpu.memory_space<vmem>>, vector<128x128xf32>
    %cst_118 = arith.constant dense<0.000000e+00> : vector<8x128xf32>
    %397 = tpu.matmul %395, %396, %cst_118 {dimension_numbers = #tpu.dot_dimension_numbers<[1], [0], [0], [1], [0, 0, 1, 1], [], []>} : vector<8x128xf32>, vector<128x128xf32>, vector<8x128xf32> -> vector<8x128xf32>
    %c0_119 = arith.constant 0 : index
    %c0_120 = arith.constant 0 : index
    %398 = vector.load %arg4[%c0_119, %c0_120] : memref<8x128xf32, #tpu.memory_space<vmem>>, vector<8x128xf32>
    tpu.vector_store %arg4[%c0_119, %c0_120], %397 {strides = array<i32>} : memref<8x128xf32, #tpu.memory_space<vmem>>, vector<8x128xf32>,
    return
  }
}

</mosaic_0001>

<bundles_post_ra>
// kernel: tpu_custom_call.1
= control target key start
LH: loop header
LB: loop body
LE: loop exit
PB: predicated region body
PF: predicated region fallthrough
CT: control target
= control target key end

     0   :  { %9 = vsyncpa [#allocation3], 0  ;;  %s3013_s0 = inlined_call_operand.hbm [shape: f32[8,8,128], index: 0, kind: input, shape index: {}]   ;;  %s3014_s1 = inlined_call_operand.hbm [shape: bf16[128,128], index: 1, kind: input, shape index: {}]   ;;  %s3015_s2 = inlined_call_operand.hbm [shape: bf16[128,128], index: 2, kind: input, shape index: {}]   ;;  %s3016_s3 = inlined_call_operand.hbm [shape: f32[128,128], index: 3, kind: input, shape index: {}]   ;;  %s3017_s4 = inlined_call_operand.hbm [shape: f32[8,128], index: 4, kind: output, shape index: {}]  }
   0x1   :  { %10 = vsyncpa [#allocation6], 0 }
   0x2   :  { %11 = vsyncpa [#allocation9], 0 }
   0x3   :  { %12 = vsyncpa [#allocation4], 0  ;;  %s2375_s15 = smov [#allocation5]   ;;  %s2257_s19 = scalar_lea.hbm %s3014_s1, 1024 }
   0x4   :  { %s30_s16 = sshll.u32 %s2375_s15, 4  ;;  %p2258_p0 = scmp.ne.s32.totalorder %s3014_s1, %s2257_s19  ;;  %s31_s16 = int_to_ptr.vmem [resolvable:$true] %s30_s16 }
   0x5   :  { %p2261_p1 = scmp.lt.u32.totalorder %s2257_s19, %s3014_s1 }
   0x7   :  { %p2263_p2 = pnand %p2261_p1, %p2258_p0 }
   0x9   :  { %2266 = shalt.err (!%p2263_p2)
}
   0xa   :  { %s2267_s24 = scalar_lea.vmem %s31_s16, 1024  ;;  %p2272_p4 = scmp.lt.s32.totalorder %s31_s16, %s31_s16 }
   0xb   :  { %p2268_p3 = scmp.ne.s32.totalorder %s31_s16, %s2267_s24  ;;  %p2273_p5 = scmp.lt.s32.totalorder %s2267_s24, %s2267_s24 }
   0xd   :  { %p2274_p6 = por %p2273_p5, %p2272_p4 }
   0xf   :  { %p2275_p7 = pnand %p2274_p6, %p2268_p3 }
  0x11   :  { %2278 = shalt.err (!%p2275_p7)
}
  0x12   :  { %s2376_s25 = smov 64   ;;  %s2377_s26 = smov 4  }
  0x13   :  { %36 = dma.hbm_to_vmem [thread:$0]  %s3014_s1, 1024, %s31_s16, [#allocation6], %s2376_s25, %s2376_s25, %s2377_s26  }
  0x14   :  { %s2378_s29 = smov [#allocation2]   ;;  %s2279_s7 = scalar_lea.hbm %s3013_s0, 1024 }
  0x15   :  { %s18_s30 = sshll.u32 %s2378_s29, 4  ;;  %p2280_p8 = scmp.ne.s32.totalorder %s3013_s0, %s2279_s7  ;;  %s19_s30 = int_to_ptr.vmem [resolvable:$true] %s18_s30 }
  0x16   :  { %p2283_p9 = scmp.lt.u32.totalorder %s2279_s7, %s3013_s0 }
  0x18   :  { %p2285_p10 = pnand %p2283_p9, %p2280_p8 }
  0x1a   :  { %2288 = shalt.err (!%p2285_p10)
}
  0x1b   :  { %s2289_s12 = scalar_lea.vmem %s19_s30, 1024  ;;  %p2294_p12 = scmp.lt.s32.totalorder %s19_s30, %s19_s30 }
  0x1c   :  { %p2290_p11 = scmp.ne.s32.totalorder %s19_s30, %s2289_s12  ;;  %p2295_p13 = scmp.lt.s32.totalorder %s2289_s12, %s2289_s12 }
  0x1e   :  { %p2296_p0 = por %p2295_p13, %p2294_p12 }
  0x20   :  { %p2297_p1 = pnand %p2296_p0, %p2290_p11 }
  0x22   :  { %2300 = shalt.err (!%p2297_p1)
}
  0x23   :  { %s2379_s1 = smov 128   ;;  %s2380_s13 = smov 8  }
  0x24   :  { %24 = dma.hbm_to_vmem [thread:$0]  %s3013_s0, 1024, %s19_s30, [#allocation3], %s2379_s1, %s2379_s1, %s2380_s13  }
  0x25   :  { %s2381_s16 = smov [#allocation7]   ;;  %s2382_s18 = smov [#allocation8]  }
  0x26   :  { %s42_s17 = sshll.u32 %s2381_s16, 4  ;;  %s54_s19 = sshll.u32 %s2382_s18, 4  ;;  %s43_s17 = int_to_ptr.vmem [resolvable:$true] %s42_s17  ;;  %s2444_s19 = int_to_ptr.vmem [resolvable:$true] %s54_s19 }
  0x27   :  { %s2301_s22 = scalar_lea.hbm %s3015_s2, 1024 }
  0x28   :  { %p2302_p2 = scmp.ne.s32.totalorder %s3015_s2, %s2301_s22  ;;  %p2305_p3 = scmp.lt.u32.totalorder %s2301_s22, %s3015_s2 }
  0x2a   :  { %p2307_p4 = pnand %p2305_p3, %p2302_p2 }
  0x2c   :  { %2310 = shalt.err (!%p2307_p4)
}
  0x2d   :  { %s2311_s0 = scalar_lea.vmem %s43_s17, 1024  ;;  %p2316_p6 = scmp.lt.s32.totalorder %s43_s17, %s43_s17 }
  0x2e   :  { %p2312_p5 = scmp.ne.s32.totalorder %s43_s17, %s2311_s0  ;;  %p2317_p7 = scmp.lt.s32.totalorder %s2311_s0, %s2311_s0 }
  0x30   :  { %p2318_p8 = por %p2317_p7, %p2316_p6 }
  0x32   :  { %p2319_p9 = pnand %p2318_p8, %p2312_p5 }
  0x34   :  { %2322 = shalt.err (!%p2319_p9)
}
  0x35   :  { %48 = dma.hbm_to_vmem [thread:$0]  %s3015_s2, 1024, %s43_s17, [#allocation6], %s2376_s25, %s2376_s25, %s2377_s26  }
  0x36   :  { %s2323_s7 = scalar_lea.hbm %s3016_s3, 2048 }
  0x37   :  { %p2324_p10 = scmp.ne.s32.totalorder %s3016_s3, %s2323_s7  ;;  %p2327_p11 = scmp.lt.u32.totalorder %s2323_s7, %s3016_s3 }
  0x39   :  { %p2329_p12 = pnand %p2327_p11, %p2324_p10 }
  0x3b   :  { %2332 = shalt.err (!%p2329_p12)
}
  0x3c   :  { %s2333_s12 = scalar_lea.vmem %s2444_s19, 2048  ;;  %p2338_p0 = scmp.lt.s32.totalorder %s2444_s19, %s2444_s19 }
  0x3d   :  { %p2334_p13 = scmp.ne.s32.totalorder %s2444_s19, %s2333_s12  ;;  %p2339_p1 = scmp.lt.s32.totalorder %s2333_s12, %s2333_s12 }
  0x3f   :  { %p2340_p2 = por %p2339_p1, %p2338_p0 }
  0x41   :  { %p2341_p3 = pnand %p2340_p2, %p2334_p13 }
  0x43   :  { %2344 = shalt.err (!%p2341_p3)
}
  0x44   :  { %60 = dma.hbm_to_vmem [thread:$0]  %s3016_s3, 2048, %s2444_s19, [#allocation9], %s2379_s1, %s2379_s1, %s2380_s13  }
  0x45   :  { %2367 = dma.done.wait [#allocation3], 1024  }
  0x46   :  { %2368 = vsyncadd [#allocation3], 4294966272 }
  0x47   :  { %2369 = dma.done.wait [#allocation6], 2048  }
  0x48   :  { %2370 = vsyncadd [#allocation6], 4294965248 }
  0x49   :  { %2371 = dma.done.wait [#allocation9], 2048  }
  0x4a   :  { %2372 = vsyncadd [#allocation9], 4294965248  ;;  %v2383_v0 = vmov 0.0   ;;  %vm2384_vm0 = vmmov 0   ;;  %v2487_v1 = vld [vmem:[#allocation5] sm:$0xff]   ;;  %v2490_v2 = vld [vmem:[#allocation5 + $0x8] sm:$0xff]   ;;  %v74_v36 = vlaneseq }
  0x4b   :  { %1704 = vmatprep.subr.bf16.mxu0 %v2383_v0  ;;  %1720 = vmatprep.mubr.msk.bf16.mxu0 %vm2384_vm0, %v2383_v0  ;;  %v2494_v3 = vld [vmem:[#allocation5 + $0x10] sm:$0xff]   ;;  %v2497_v4 = vld [vmem:[#allocation5 + $0x18] sm:$0xff]   ;;  %v2502_v5 = vld [vmem:[#allocation5 + $0x20] sm:$0xff]   ;;  %s2385_s3 = smov 32   ;;  %s2386_s1 = smov 65   ;;  %vm354_vm2 = vcmask 261120  }
  0x4c   :  { %1724 = vmatprep.subr.bf16.mxu1 %v2383_v0  ;;  %1740 = vmatprep.mubr.msk.bf16.mxu1 %vm2384_vm0, %v2383_v0  ;;  %v2506_v6 = vld [vmem:[#allocation5 + $0x28] sm:$0xff]   ;;  %v2510_v7 = vld [vmem:[#allocation5 + $0x30] sm:$0xff]   ;;  %v2514_v8 = vld [vmem:[#allocation5 + $0x38] sm:$0xff]   ;;  %v75_v37 = vand.u32 127, %v74_v36  ;;  %vm215_vm3 = vcmask 269312   ;;  %vm217_vm4 = vcmask 531456  }
  0x4d   :  { %1705 = vmatpush3.bf16.msra.mxu0 %v2487_v1  ;;  %v79_v9 = vld [vmem:[#allocation2] sm:$0xff]  ;;  %v2545_v26 = vld [vmem:[#allocation7 + $0x8] sm:$0xff]   ;;  %v2549_v27 = vld [vmem:[#allocation7 + $0x10] sm:$0xff]  }
  0x4e   :  { %1706 = vmatprep.subr.bf16.mxu0 %v2383_v0  ;;  %v81_v10 = vpack.c.bf16 %v79_v9, %v79_v9  ;;  %v2542_v25 = vld [vmem:[#allocation7] sm:$0xff]   ;;  %v2553_v29 = vld [vmem:[#allocation7 + $0x18] sm:$0xff]   ;;  %v2562_v31 = vld [vmem:[#allocation7 + $0x28] sm:$0xff]   ;;  %vm76_vm1 = vcmp.eq.s32.totalorder %v75_v37, 32 }
  0x4f   :  { %1725 = vmatpush3.bf16.msra.mxu1 %v2542_v25  ;;  %v2558_v30 = vld [vmem:[#allocation7 + $0x20] sm:$0xff]   ;;  %v2566_v32 = vld [vmem:[#allocation7 + $0x30] sm:$0xff]   ;;  %v2571_v33 = vld [vmem:[#allocation7 + $0x38] sm:$0xff]   ;;  %v2578_v40 = vsel %vm76_vm1, 1.0, %v2383_v0 }
  0x50   :  { %1726 = vmatprep.subr.bf16.mxu1 %v2383_v0  ;;  %v350_v38 = vld [vmem:[#allocation2 + $0x8] sm:$0xff] }
  0x51   :  { %1707 = vmatpush3.bf16.msra.mxu0 %v2490_v2 }
  0x52   :  { %1708 = vmatprep.subr.bf16.mxu0 %v2383_v0 }
  0x53   :  { %1727 = vmatpush3.bf16.msra.mxu1 %v2545_v26 }
  0x54   :  { %1728 = vmatprep.subr.bf16.mxu1 %v2383_v0 }
  0x55   :  { %1709 = vmatpush3.bf16.msra.mxu0 %v2494_v3 }
  0x56   :  { %1710 = vmatprep.subr.bf16.mxu0 %v2383_v0 }
  0x57   :  { %1729 = vmatpush3.bf16.msra.mxu1 %v2549_v27 }
  0x58   :  { %1730 = vmatprep.subr.bf16.mxu1 %v2383_v0 }
  0x59   :  { %1711 = vmatpush3.bf16.msra.mxu0 %v2497_v4 }
  0x5a   :  { %1712 = vmatprep.subr.bf16.mxu0 %v2383_v0 }
  0x5b   :  { %1731 = vmatpush3.bf16.msra.mxu1 %v2553_v29 }
  0x5c   :  { %1732 = vmatprep.subr.bf16.mxu1 %v2383_v0 }
  0x5d   :  { %1713 = vmatpush3.bf16.msra.mxu0 %v2502_v5 }
  0x5e   :  { %1714 = vmatprep.subr.bf16.mxu0 %v2383_v0 }
  0x5f   :  { %1733 = vmatpush3.bf16.msra.mxu1 %v2558_v30 }
  0x60   :  { %1734 = vmatprep.subr.bf16.mxu1 %v2383_v0 }
  0x61   :  { %1715 = vmatpush3.bf16.msra.mxu0 %v2506_v6 }
  0x62   :  { %1716 = vmatprep.subr.bf16.mxu0 %v2383_v0 }
  0x63   :  { %1735 = vmatpush3.bf16.msra.mxu1 %v2562_v31 }
  0x64   :  { %1736 = vmatprep.subr.bf16.mxu1 %v2383_v0 }
  0x65   :  { %1717 = vmatpush3.bf16.msra.mxu0 %v2510_v7 }
  0x66   :  { %1718 = vmatprep.subr.bf16.mxu0 %v2383_v0 }
  0x67   :  { %1737 = vmatpush3.bf16.msra.mxu1 %v2566_v32 }
  0x68   :  { %1738 = vmatprep.subr.bf16.mxu1 %v2383_v0 }
  0x69   :  { %1719 = vmatpush3.bf16.msra.mxu0 %v2514_v8 }
  0x6a   :  { %1744 = vmatprep.subr.bf16.mxu0 %v2383_v0 }
  0x6b   :  { %1739 = vmatpush3.bf16.msra.mxu1 %v2571_v33 }
  0x6c   :  { %1721 = vmatmul.mubr.bf16.vlgmr.msra.gmra.mrb[0].mxu0 %v81_v10  ;;  %1764 = vmatprep.subr.bf16.mxu1 %v2383_v0 }
  0x6d   :  { %1745 = vmatpush3.bf16.msra.mxu0 %v2487_v1  ;;  %1760 = vmatprep.mubr.msk.bf16.mxu0 %vm2384_vm0, %v2383_v0 }
  0x6e   :  { %1746 = vmatprep.subr.bf16.mxu0 %v2383_v0 }
  0x71   :  { %1747 = vmatpush3.bf16.msra.mxu0 %v2490_v2 }
  0x72   :  { %1748 = vmatprep.subr.bf16.mxu0 %v2383_v0 }
  0x75   :  { %1749 = vmatpush3.bf16.msra.mxu0 %v2494_v3 }
  0x76   :  { %1750 = vmatprep.subr.bf16.mxu0 %v2383_v0 }
  0x79   :  { %1751 = vmatpush3.bf16.msra.mxu0 %v2497_v4 }
  0x7a   :  { %1752 = vmatprep.subr.bf16.mxu0 %v2383_v0 }
  0x7d   :  { %1753 = vmatpush3.bf16.msra.mxu0 %v2502_v5 }
  0x7e   :  { %1754 = vmatprep.subr.bf16.mxu0 %v2383_v0 }
  0x81   :  { %1755 = vmatpush3.bf16.msra.mxu0 %v2506_v6 }
  0x82   :  { %1756 = vmatprep.subr.bf16.mxu0 %v2383_v0 }
  0x85   :  { %1757 = vmatpush3.bf16.msra.mxu0 %v2510_v7 }
  0x86   :  { %1758 = vmatprep.subr.bf16.mxu0 %v2383_v0 }
  0x89   :  { %1759 = vmatpush3.bf16.msra.mxu0 %v2514_v8 }
  0x8a   :  { %1784 = vmatprep.subr.bf16.mxu0 %v2383_v0 }
 0x13f   :  { %v180_v11 = vpop.f32.mrb[0].mxu0 }
 0x140   :  { %2113 = vtanh.f32 %v180_v11  ;;  %v1722_v12 = vpop.f32.mrb[1].mxu0  ;;  %v1519_v16 = vmul.f32 -1.442695, %v180_v11 }
 0x141   :  { %v183_v13 = vpop.f32.mrb[2].mxu0 }
 0x142   :  { %v1723_v14 = vpop.f32.mrb[3].mxu0  ;;  %2115 = vpow2.f32 %v1519_v16 }
 0x14a   :  { %v2114_v15 = vpop.eup %2113 }
 0x14b   :  { %195 = vrot.lane.b32.xlu0 %v2114_v15, %s2376_s25 }
 0x14c   :  { %v2116_v17 = vpop.eup %2115 }
 0x14d   :  { %v189_v18 = vadd.f32 1.0, %v2116_v17 }
 0x14f   :  { %2117 = vrcp.f32 %v189_v18 }
 0x159   :  { %v2118_v19 = vpop.eup %2117 }
 0x15a   :  { %v193_v22 = vmul.f32 0.0, %v2118_v19 }
 0x1bd   :  { %v196_v20 = vpop.permute.xlu0 %195 }
 0x1be   :  { %v198_v21 = vmul.f32 %v2118_v19, %v196_v20 }
 0x1c0   :  { %200 = vrot.lane.b32.xlu0 %v198_v21, %s2385_s3 }
 0x232   :  { %v201_v23 = vpop.permute.xlu0 %200 }
 0x233   :  { %v2539_v24 = vadd.f32 %v201_v23, %v193_v22 }
 0x235   :  { %2119 = vtanh.f32 %v2539_v24 }
 0x23f   :  { %v2120_v28 = vpop.eup %2119 }
 0x240   :  { %206 = vrot.lane.b32.xlu1 %v2120_v28, %s2376_s25 }
 0x2b2   :  { %v207_v34 = vpop.permute.xlu1 %206 }
 0x2b3   :  { %v209_v35 = vmul.f32 %v2118_v19, %v207_v34 }
 0x2b5   :  { %351 = vrot.lane.b32.xlu0 %v209_v35, %s2385_s3  ;;  %212 = vrot.lane.b32.xlu1 %v209_v35, %s2386_s1 }
 0x327   :  { %v352_v39 = vpop.permute.xlu0 %351  ;;  %v213_v41 = vpop.permute.xlu1 %212 }
 0x328   :  { %v355_v42 = vsel %vm354_vm2, %v352_v39, 0.0  ;;  %v216_v43 = vsel %vm215_vm3, 0.0, %v213_v41 }
 0x329   :  { %v356_v44 = vadd.f32 %v355_v42, %v350_v38  ;;  %v218_v45 = vsel %vm217_vm4, %v216_v43, 0.0  ;;  %v501_v43 = vld [vmem:[#allocation2 + $0x10] sm:$0xff] }
 0x32a   :  { %v219_v46 = vadd.f32 %v2578_v40, %v218_v45 }
 0x32b   :  { %v357_v47 = vpack.c.bf16 %v356_v44, %v356_v44 }
 0x32c   :  { %v220_v48 = vpack.c.bf16 %v219_v46, %v219_v46 }
 0x32d   :  { %1761 = vmatmul.mubr.bf16.vlgmr.msra.gmra.mrb[4].mxu0 %v357_v47 }
 0x32e   :  { %1741 = vmatmul.mubr.bf16.vlgmr.msra.gmra.mrb[0].mxu1 %v220_v48  ;;  %1785 = vmatpush3.bf16.msra.mxu0 %v2487_v1 }
 0x32f   :  { %1765 = vmatpush3.bf16.msra.mxu1 %v2542_v25  ;;  %1786 = vmatprep.subr.bf16.mxu0 %v2383_v0 }
 0x330   :  { %1766 = vmatprep.subr.bf16.mxu1 %v2383_v0  ;;  %1780 = vmatprep.mubr.msk.bf16.mxu1 %vm2384_vm0, %v2383_v0 }
 0x331   :  { %1800 = vmatprep.mubr.msk.bf16.mxu0 %vm2384_vm0, %v2383_v0 }
 0x332   :  { %1787 = vmatpush3.bf16.msra.mxu0 %v2490_v2 }
 0x333   :  { %1767 = vmatpush3.bf16.msra.mxu1 %v2545_v26  ;;  %1788 = vmatprep.subr.bf16.mxu0 %v2383_v0 }
 0x334   :  { %1768 = vmatprep.subr.bf16.mxu1 %v2383_v0 }
 0x336   :  { %1789 = vmatpush3.bf16.msra.mxu0 %v2494_v3 }
 0x337   :  { %1769 = vmatpush3.bf16.msra.mxu1 %v2549_v27  ;;  %1790 = vmatprep.subr.bf16.mxu0 %v2383_v0 }
 0x338   :  { %1770 = vmatprep.subr.bf16.mxu1 %v2383_v0 }
 0x33a   :  { %1791 = vmatpush3.bf16.msra.mxu0 %v2497_v4 }
 0x33b   :  { %1771 = vmatpush3.bf16.msra.mxu1 %v2553_v29  ;;  %1792 = vmatprep.subr.bf16.mxu0 %v2383_v0 }
 0x33c   :  { %1772 = vmatprep.subr.bf16.mxu1 %v2383_v0 }
 0x33e   :  { %1793 = vmatpush3.bf16.msra.mxu0 %v2502_v5 }
 0x33f   :  { %1773 = vmatpush3.bf16.msra.mxu1 %v2558_v30  ;;  %1794 = vmatprep.subr.bf16.mxu0 %v2383_v0 }
 0x340   :  { %1774 = vmatprep.subr.bf16.mxu1 %v2383_v0 }
 0x342   :  { %1795 = vmatpush3.bf16.msra.mxu0 %v2506_v6 }
 0x343   :  { %1775 = vmatpush3.bf16.msra.mxu1 %v2562_v31  ;;  %1796 = vmatprep.subr.bf16.mxu0 %v2383_v0 }
 0x344   :  { %1776 = vmatprep.subr.bf16.mxu1 %v2383_v0 }
 0x346   :  { %1797 = vmatpush3.bf16.msra.mxu0 %v2510_v7 }
 0x347   :  { %1777 = vmatpush3.bf16.msra.mxu1 %v2566_v32  ;;  %1798 = vmatprep.subr.bf16.mxu0 %v2383_v0 }
 0x348   :  { %1778 = vmatprep.subr.bf16.mxu1 %v2383_v0 }
 0x34a   :  { %1799 = vmatpush3.bf16.msra.mxu0 %v2514_v8 }
 0x34b   :  { %1779 = vmatpush3.bf16.msra.mxu1 %v2571_v33  ;;  %1824 = vmatprep.subr.bf16.mxu0 %v2383_v0 }
 0x34c   :  { %1804 = vmatprep.subr.bf16.mxu1 %v2383_v0 }
 0x400   :  { %v392_v49 = vpop.f32.mrb[4].mxu0 }
 0x401   :  { %2121 = vtanh.f32 %v392_v49  ;;  %v319_v50 = vpop.f32.mrb[0].mxu1  ;;  %v1762_v51 = vpop.f32.mrb[5].mxu0  ;;  %v1529_v59 = vmul.f32 -1.442695, %v392_v49 }
 0x402   :  { %2123 = vtanh.f32 %v319_v50  ;;  %v1742_v52 = vpop.f32.mrb[1].mxu1  ;;  %v395_v53 = vpop.f32.mrb[6].mxu0  ;;  %v1528_v60 = vmul.f32 -1.442695, %v319_v50 }
 0x403   :  { %v322_v54 = vpop.f32.mrb[2].mxu1  ;;  %v1763_v55 = vpop.f32.mrb[7].mxu0  ;;  %2125 = vpow2.f32 %v1529_v59 }
 0x404   :  { %v1743_v56 = vpop.f32.mrb[3].mxu1  ;;  %2127 = vpow2.f32 %v1528_v60 }
 0x40b   :  { %v2122_v57 = vpop.eup %2121 }
 0x40c   :  { %v2124_v58 = vpop.eup %2123  ;;  %407 = vrot.lane.b32.xlu0 %v2122_v57, %s2376_s25 }
 0x40d   :  { %334 = vrot.lane.b32.xlu1 %v2124_v58, %s2376_s25  ;;  %v2126_v61 = vpop.eup %2125 }
 0x40e   :  { %v2128_v62 = vpop.eup %2127  ;;  %v401_v63 = vadd.f32 1.0, %v2126_v61 }
 0x40f   :  { %v328_v9 = vadd.f32 1.0, %v2128_v62 }
 0x410   :  { %2129 = vrcp.f32 %v401_v63 }
 0x411   :  { %2131 = vrcp.f32 %v328_v9 }
 0x41a   :  { %v2130_v10 = vpop.eup %2129 }
 0x41b   :  { %v2132_v12 = vpop.eup %2131  ;;  %v405_v16 = vmul.f32 %v2130_v10, %v2539_v24 }
 0x41c   :  { %v332_v18 = vmul.f32 0.0, %v2132_v12 }
 0x47e   :  { %v408_v11 = vpop.permute.xlu0 %407 }
 0x47f   :  { %v410_v13 = vmul.f32 %v2130_v10, %v408_v11  ;;  %v335_v14 = vpop.permute.xlu1 %334 }
 0x480   :  { %v337_v15 = vmul.f32 %v2132_v12, %v335_v14 }
 0x481   :  { %412 = vrot.lane.b32.xlu0 %v410_v13, %s2385_s3 }
 0x482   :  { %339 = vrot.lane.b32.xlu1 %v337_v15, %s2385_s3 }
 0x4f3   :  { %v413_v17 = vpop.permute.xlu0 %412 }
 0x4f4   :  { %v2625_v19 = vadd.f32 %v413_v17, %v405_v16  ;;  %v340_v20 = vpop.permute.xlu1 %339 }
 0x4f5   :  { %v2627_v21 = vadd.f32 %v340_v20, %v332_v18 }
 0x4f6   :  { %2133 = vtanh.f32 %v2625_v19 }
 0x4f7   :  { %2135 = vtanh.f32 %v2627_v21 }
 0x500   :  { %v2134_v22 = vpop.eup %2133 }
 0x501   :  { %v2136_v23 = vpop.eup %2135  ;;  %418 = vrot.lane.b32.xlu0 %v2134_v22, %s2376_s25 }
 0x502   :  { %345 = vrot.lane.b32.xlu1 %v2136_v23, %s2376_s25 }
 0x573   :  { %v419_v28 = vpop.permute.xlu0 %418 }
 0x574   :  { %v421_v34 = vmul.f32 %v2130_v10, %v419_v28  ;;  %v346_v24 = vpop.permute.xlu1 %345 }
 0x575   :  { %v348_v35 = vmul.f32 %v2132_v12, %v346_v24 }
 0x576   :  { %429 = vrot.lane.b32.xlu0 %v421_v34, %s2386_s1 }
 0x577   :  { %423 = vrot.lane.b32.xlu1 %v348_v35, %s2385_s3 }
 0x57b   :  { %502 = vrot.lane.b32.xlu1 %v421_v34, %s2385_s3 }
 0x5e8   :  { %v430_v36 = vpop.permute.xlu0 %429 }
 0x5e9   :  { %v432_v37 = vsel %vm215_vm3, 0.0, %v430_v36  ;;  %v424_v38 = vpop.permute.xlu1 %423 }
 0x5ea   :  { %v426_v39 = vsel %vm354_vm2, %v424_v38, 0.0  ;;  %v433_v42 = vsel %vm217_vm4, %v432_v37, 0.0 }
 0x5eb   :  { %v427_v41 = vadd.f32 %v2578_v40, %v426_v39 }
 0x5ed   :  { %v434_v44 = vadd.f32 %v433_v42, %v427_v41  ;;  %v503_v45 = vpop.permute.xlu1 %502  ;;  %v651_v42 = vld [vmem:[#allocation2 + $0x18] sm:$0xff] }
 0x5ee   :  { %v505_v46 = vsel %vm354_vm2, %v503_v45, 0.0 }
 0x5ef   :  { %v435_v47 = vpack.c.bf16 %v434_v44, %v434_v44  ;;  %v506_v48 = vadd.f32 %v505_v46, %v501_v43 }
 0x5f1   :  { %v507_v49 = vpack.c.bf16 %v506_v48, %v506_v48  ;;  %1781 = vmatmul.mubr.bf16.vlgmr.msra.gmra.mrb[4].mxu1 %v435_v47 }
 0x5f2   :  { %1805 = vmatpush3.bf16.msra.mxu1 %v2542_v25  ;;  %1820 = vmatprep.mubr.msk.bf16.mxu1 %vm2384_vm0, %v2383_v0 }
 0x5f3   :  { %1801 = vmatmul.mubr.bf16.vlgmr.msra.gmra.mrb[8].mxu0 %v507_v49  ;;  %1806 = vmatprep.subr.bf16.mxu1 %v2383_v0 }
 0x5f4   :  { %1825 = vmatpush3.bf16.msra.mxu0 %v2487_v1  ;;  %1840 = vmatprep.mubr.msk.bf16.mxu0 %vm2384_vm0, %v2383_v0 }
 0x5f5   :  { %1826 = vmatprep.subr.bf16.mxu0 %v2383_v0 }
 0x5f6   :  { %1807 = vmatpush3.bf16.msra.mxu1 %v2545_v26 }
 0x5f7   :  { %1808 = vmatprep.subr.bf16.mxu1 %v2383_v0 }
 0x5f8   :  { %1827 = vmatpush3.bf16.msra.mxu0 %v2490_v2 }
 0x5f9   :  { %1828 = vmatprep.subr.bf16.mxu0 %v2383_v0 }
 0x5fa   :  { %1809 = vmatpush3.bf16.msra.mxu1 %v2549_v27 }
 0x5fb   :  { %1810 = vmatprep.subr.bf16.mxu1 %v2383_v0 }
 0x5fc   :  { %1829 = vmatpush3.bf16.msra.mxu0 %v2494_v3 }
 0x5fd   :  { %1830 = vmatprep.subr.bf16.mxu0 %v2383_v0 }
 0x5fe   :  { %1811 = vmatpush3.bf16.msra.mxu1 %v2553_v29 }
 0x5ff   :  { %1812 = vmatprep.subr.bf16.mxu1 %v2383_v0 }
 0x600   :  { %1831 = vmatpush3.bf16.msra.mxu0 %v2497_v4 }
 0x601   :  { %1832 = vmatprep.subr.bf16.mxu0 %v2383_v0 }
 0x602   :  { %1813 = vmatpush3.bf16.msra.mxu1 %v2558_v30 }
 0x603   :  { %1814 = vmatprep.subr.bf16.mxu1 %v2383_v0 }
 0x604   :  { %1833 = vmatpush3.bf16.msra.mxu0 %v2502_v5 }
 0x605   :  { %1834 = vmatprep.subr.bf16.mxu0 %v2383_v0 }
 0x606   :  { %1815 = vmatpush3.bf16.msra.mxu1 %v2562_v31 }
 0x607   :  { %1816 = vmatprep.subr.bf16.mxu1 %v2383_v0 }
 0x608   :  { %1835 = vmatpush3.bf16.msra.mxu0 %v2506_v6 }
 0x609   :  { %1836 = vmatprep.subr.bf16.mxu0 %v2383_v0 }
 0x60a   :  { %1817 = vmatpush3.bf16.msra.mxu1 %v2566_v32 }
 0x60b   :  { %1818 = vmatprep.subr.bf16.mxu1 %v2383_v0 }
 0x60c   :  { %1837 = vmatpush3.bf16.msra.mxu0 %v2510_v7 }
 0x60d   :  { %1838 = vmatprep.subr.bf16.mxu0 %v2383_v0 }
 0x60e   :  { %1819 = vmatpush3.bf16.msra.mxu1 %v2571_v33 }
 0x60f   :  { %1844 = vmatprep.subr.bf16.mxu1 %v2383_v0 }
 0x610   :  { %1839 = vmatpush3.bf16.msra.mxu0 %v2514_v8 }
 0x611   :  { %1864 = vmatprep.subr.bf16.mxu0 %v2383_v0 }
 0x6c4   :  { %v470_v50 = vpop.f32.mrb[4].mxu1 }
 0x6c5   :  { %2137 = vtanh.f32 %v470_v50  ;;  %v1782_v51 = vpop.f32.mrb[5].mxu1  ;;  %v1530_v60 = vmul.f32 -1.442695, %v470_v50 }
 0x6c6   :  { %v473_v52 = vpop.f32.mrb[6].mxu1  ;;  %v542_v53 = vpop.f32.mrb[8].mxu0 }
 0x6c7   :  { %v1783_v54 = vpop.f32.mrb[7].mxu1  ;;  %v1802_v55 = vpop.f32.mrb[9].mxu0  ;;  %2139 = vtanh.f32 %v542_v53  ;;  %v1531_v61 = vmul.f32 -1.442695, %v542_v53 }
 0x6c8   :  { %v545_v56 = vpop.f32.mrb[10].mxu0  ;;  %2141 = vpow2.f32 %v1530_v60 }
 0x6c9   :  { %v1803_v57 = vpop.f32.mrb[11].mxu0  ;;  %2143 = vpow2.f32 %v1531_v61 }
 0x6cf   :  { %v2138_v58 = vpop.eup %2137 }
 0x6d0   :  { %485 = vrot.lane.b32.xlu0 %v2138_v58, %s2376_s25 }
 0x6d1   :  { %v2140_v59 = vpop.eup %2139 }
 0x6d2   :  { %557 = vrot.lane.b32.xlu1 %v2140_v59, %s2376_s25  ;;  %v2142_v62 = vpop.eup %2141 }
 0x6d3   :  { %v2144_v63 = vpop.eup %2143  ;;  %v479_v9 = vadd.f32 1.0, %v2142_v62 }
 0x6d4   :  { %v551_v10 = vadd.f32 1.0, %v2144_v63 }
 0x6d5   :  { %2145 = vrcp.f32 %v479_v9 }
 0x6d6   :  { %2147 = vrcp.f32 %v551_v10 }
 0x6df   :  { %v2146_v11 = vpop.eup %2145 }
 0x6e0   :  { %v2148_v14 = vpop.eup %2147  ;;  %v483_v17 = vmul.f32 %v2146_v11, %v2627_v21 }
 0x6e1   :  { %v555_v22 = vmul.f32 %v2148_v14, %v2625_v19 }
 0x742   :  { %v486_v12 = vpop.permute.xlu0 %485 }
 0x743   :  { %v488_v13 = vmul.f32 %v2146_v11, %v486_v12 }
 0x744   :  { %v558_v15 = vpop.permute.xlu1 %557 }
 0x745   :  { %490 = vrot.lane.b32.xlu0 %v488_v13, %s2385_s3  ;;  %v560_v16 = vmul.f32 %v2148_v14, %v558_v15 }
 0x747   :  { %562 = vrot.lane.b32.xlu1 %v560_v16, %s2385_s3 }
 0x7b7   :  { %v491_v18 = vpop.permute.xlu0 %490 }
 0x7b8   :  { %v2682_v20 = vadd.f32 %v491_v18, %v483_v17 }
 0x7b9   :  { %v563_v23 = vpop.permute.xlu1 %562 }
 0x7ba   :  { %2149 = vtanh.f32 %v2682_v20  ;;  %v2686_v28 = vadd.f32 %v563_v23, %v555_v22 }
 0x7bc   :  { %2151 = vtanh.f32 %v2686_v28 }
 0x7c4   :  { %v2150_v34 = vpop.eup %2149 }
 0x7c5   :  { %496 = vrot.lane.b32.xlu0 %v2150_v34, %s2376_s25 }
 0x7c6   :  { %v2152_v24 = vpop.eup %2151 }
 0x7c7   :  { %568 = vrot.lane.b32.xlu1 %v2152_v24, %s2376_s25 }
 0x837   :  { %v497_v35 = vpop.permute.xlu0 %496 }
 0x838   :  { %v499_v21 = vmul.f32 %v2146_v11, %v497_v35 }
 0x839   :  { %v569_v36 = vpop.permute.xlu1 %568 }
 0x83a   :  { %573 = vrot.lane.b32.xlu0 %v499_v21, %s2385_s3  ;;  %v571_v37 = vmul.f32 %v2148_v14, %v569_v36 }
 0x83c   :  { %579 = vrot.lane.b32.xlu1 %v571_v37, %s2386_s1 }
 0x83e   :  { %652 = vrot.lane.b32.xlu0 %v571_v37, %s2385_s3 }
 0x8ac   :  { %v574_v19 = vpop.permute.xlu0 %573 }
 0x8ad   :  { %v576_v38 = vsel %vm354_vm2, %v574_v19, 0.0 }
 0x8ae   :  { %v577_v39 = vadd.f32 %v2578_v40, %v576_v38  ;;  %v580_v41 = vpop.permute.xlu1 %579 }
 0x8af   :  { %v582_v43 = vsel %vm215_vm3, 0.0, %v580_v41 }
 0x8b0   :  { %v653_v44 = vpop.permute.xlu0 %652  ;;  %v583_v45 = vsel %vm217_vm4, %v582_v43, 0.0 }
 0x8b1   :  { %v655_v46 = vsel %vm354_vm2, %v653_v44, 0.0  ;;  %v584_v47 = vadd.f32 %v583_v45, %v577_v39  ;;  %v801_v45 = vld [vmem:[#allocation2 + $0x20] sm:$0xff] }
 0x8b2   :  { %v656_v48 = vadd.f32 %v655_v46, %v651_v42 }
 0x8b3   :  { %v585_v49 = vpack.c.bf16 %v584_v47, %v584_v47 }
 0x8b4   :  { %v657_v50 = vpack.c.bf16 %v656_v48, %v656_v48 }
 0x8b5   :  { %1821 = vmatmul.mubr.bf16.vlgmr.msra.gmra.mrb[8].mxu1 %v585_v49 }
 0x8b6   :  { %1841 = vmatmul.mubr.bf16.vlgmr.msra.gmra.mrb[12].mxu0 %v657_v50  ;;  %1845 = vmatpush3.bf16.msra.mxu1 %v2542_v25 }
 0x8b7   :  { %1865 = vmatpush3.bf16.msra.mxu0 %v2487_v1  ;;  %1846 = vmatprep.subr.bf16.mxu1 %v2383_v0 }
 0x8b8   :  { %1866 = vmatprep.subr.bf16.mxu0 %v2383_v0  ;;  %1860 = vmatprep.mubr.msk.bf16.mxu1 %vm2384_vm0, %v2383_v0 }
 0x8b9   :  { %1880 = vmatprep.mubr.msk.bf16.mxu0 %vm2384_vm0, %v2383_v0 }
 0x8ba   :  { %1847 = vmatpush3.bf16.msra.mxu1 %v2545_v26 }
 0x8bb   :  { %1867 = vmatpush3.bf16.msra.mxu0 %v2490_v2  ;;  %1848 = vmatprep.subr.bf16.mxu1 %v2383_v0 }
 0x8bc   :  { %1868 = vmatprep.subr.bf16.mxu0 %v2383_v0 }
 0x8be   :  { %1849 = vmatpush3.bf16.msra.mxu1 %v2549_v27 }
 0x8bf   :  { %1869 = vmatpush3.bf16.msra.mxu0 %v2494_v3  ;;  %1850 = vmatprep.subr.bf16.mxu1 %v2383_v0 }
 0x8c0   :  { %1870 = vmatprep.subr.bf16.mxu0 %v2383_v0 }
 0x8c2   :  { %1851 = vmatpush3.bf16.msra.mxu1 %v2553_v29 }
 0x8c3   :  { %1871 = vmatpush3.bf16.msra.mxu0 %v2497_v4  ;;  %1852 = vmatprep.subr.bf16.mxu1 %v2383_v0 }
 0x8c4   :  { %1872 = vmatprep.subr.bf16.mxu0 %v2383_v0 }
 0x8c6   :  { %1853 = vmatpush3.bf16.msra.mxu1 %v2558_v30 }
 0x8c7   :  { %1873 = vmatpush3.bf16.msra.mxu0 %v2502_v5  ;;  %1854 = vmatprep.subr.bf16.mxu1 %v2383_v0 }
 0x8c8   :  { %1874 = vmatprep.subr.bf16.mxu0 %v2383_v0 }
 0x8ca   :  { %1855 = vmatpush3.bf16.msra.mxu1 %v2562_v31 }
 0x8cb   :  { %1875 = vmatpush3.bf16.msra.mxu0 %v2506_v6  ;;  %1856 = vmatprep.subr.bf16.mxu1 %v2383_v0 }
 0x8cc   :  { %1876 = vmatprep.subr.bf16.mxu0 %v2383_v0 }
 0x8ce   :  { %1857 = vmatpush3.bf16.msra.mxu1 %v2566_v32 }
 0x8cf   :  { %1877 = vmatpush3.bf16.msra.mxu0 %v2510_v7  ;;  %1858 = vmatprep.subr.bf16.mxu1 %v2383_v0 }
 0x8d0   :  { %1878 = vmatprep.subr.bf16.mxu0 %v2383_v0 }
 0x8d2   :  { %1859 = vmatpush3.bf16.msra.mxu1 %v2571_v33 }
 0x8d3   :  { %1879 = vmatpush3.bf16.msra.mxu0 %v2514_v8  ;;  %1884 = vmatprep.subr.bf16.mxu1 %v2383_v0 }
 0x8d4   :  { %1904 = vmatprep.subr.bf16.mxu0 %v2383_v0 }
 0x988   :  { %v620_v51 = vpop.f32.mrb[8].mxu1 }
 0x989   :  { %v692_v52 = vpop.f32.mrb[12].mxu0  ;;  %2153 = vtanh.f32 %v620_v51  ;;  %v1822_v53 = vpop.f32.mrb[9].mxu1  ;;  %v1532_v61 = vmul.f32 -1.442695, %v620_v51 }
 0x98a   :  { %v1842_v54 = vpop.f32.mrb[13].mxu0  ;;  %2155 = vtanh.f32 %v692_v52  ;;  %v623_v55 = vpop.f32.mrb[10].mxu1  ;;  %v1533_v62 = vmul.f32 -1.442695, %v692_v52 }
 0x98b   :  { %v695_v56 = vpop.f32.mrb[14].mxu0  ;;  %v1823_v57 = vpop.f32.mrb[11].mxu1  ;;  %2157 = vpow2.f32 %v1532_v61 }
 0x98c   :  { %v1843_v58 = vpop.f32.mrb[15].mxu0  ;;  %2159 = vpow2.f32 %v1533_v62 }
 0x993   :  { %v2154_v59 = vpop.eup %2153 }
 0x994   :  { %v2156_v60 = vpop.eup %2155  ;;  %635 = vrot.lane.b32.xlu1 %v2154_v59, %s2376_s25 }
 0x995   :  { %707 = vrot.lane.b32.xlu0 %v2156_v60, %s2376_s25  ;;  %v2158_v63 = vpop.eup %2157 }
 0x996   :  { %v2160_v9 = vpop.eup %2159  ;;  %v629_v10 = vadd.f32 1.0, %v2158_v63 }
 0x997   :  { %v701_v11 = vadd.f32 1.0, %v2160_v9 }
 0x998   :  { %2161 = vrcp.f32 %v629_v10 }
 0x999   :  { %2163 = vrcp.f32 %v701_v11 }
 0x9a2   :  { %v2162_v12 = vpop.eup %2161 }
 0x9a3   :  { %v2164_v14 = vpop.eup %2163  ;;  %v633_v18 = vmul.f32 %v2162_v12, %v2682_v20 }
 0x9a4   :  { %v705_v23 = vmul.f32 %v2164_v14, %v2686_v28 }
 0xa06   :  { %v636_v13 = vpop.permute.xlu1 %635 }
 0xa07   :  { %v638_v15 = vmul.f32 %v2162_v12, %v636_v13  ;;  %v708_v16 = vpop.permute.xlu0 %707 }
 0xa08   :  { %v710_v17 = vmul.f32 %v2164_v14, %v708_v16 }
 0xa09   :  { %640 = vrot.lane.b32.xlu1 %v638_v15, %s2385_s3 }
 0xa0a   :  { %712 = vrot.lane.b32.xlu0 %v710_v17, %s2385_s3 }
 0xa7b   :  { %v641_v22 = vpop.permute.xlu1 %640 }
 0xa7c   :  { %v2741_v34 = vadd.f32 %v641_v22, %v633_v18  ;;  %v713_v24 = vpop.permute.xlu0 %712 }
 0xa7d   :  { %v2743_v35 = vadd.f32 %v713_v24, %v705_v23 }
 0xa7e   :  { %2165 = vtanh.f32 %v2741_v34 }
 0xa7f   :  { %2167 = vtanh.f32 %v2743_v35 }
 0xa88   :  { %v2166_v21 = vpop.eup %2165 }
 0xa89   :  { %v2168_v36 = vpop.eup %2167  ;;  %646 = vrot.lane.b32.xlu1 %v2166_v21, %s2376_s25 }
 0xa8a   :  { %718 = vrot.lane.b32.xlu0 %v2168_v36, %s2376_s25 }
 0xafb   :  { %v647_v37 = vpop.permute.xlu1 %646 }
 0xafc   :  { %v649_v20 = vmul.f32 %v2162_v12, %v647_v37  ;;  %v719_v19 = vpop.permute.xlu0 %718 }
 0xafd   :  { %v721_v38 = vmul.f32 %v2164_v14, %v719_v19 }
 0xafe   :  { %723 = vrot.lane.b32.xlu1 %v649_v20, %s2385_s3  ;;  %v951_v20 = vld [vmem:[#allocation2 + $0x28] sm:$0xff] }
 0xaff   :  { %729 = vrot.lane.b32.xlu0 %v721_v38, %s2386_s1 }
 0xb02   :  { %802 = vrot.lane.b32.xlu1 %v721_v38, %s2385_s3 }
 0xb70   :  { %v724_v28 = vpop.permute.xlu1 %723 }
 0xb71   :  { %v726_v39 = vsel %vm354_vm2, %v724_v28, 0.0  ;;  %v730_v41 = vpop.permute.xlu0 %729 }
 0xb72   :  { %v727_v42 = vadd.f32 %v2578_v40, %v726_v39  ;;  %v732_v43 = vsel %vm215_vm3, 0.0, %v730_v41 }
 0xb73   :  { %v733_v44 = vsel %vm217_vm4, %v732_v43, 0.0 }
 0xb74   :  { %v734_v46 = vadd.f32 %v733_v44, %v727_v42  ;;  %v803_v47 = vpop.permute.xlu1 %802 }
 0xb75   :  { %v805_v48 = vsel %vm354_vm2, %v803_v47, 0.0 }
 0xb76   :  { %v735_v49 = vpack.c.bf16 %v734_v46, %v734_v46  ;;  %v806_v50 = vadd.f32 %v805_v48, %v801_v45  ;;  %v2816_v45 = vld [vmem:[#allocation5] sm:$0xff]   ;;  %v2826_v46 = vld [vmem:[#allocation5 + $0x8] sm:$0xff]  }
 0xb78   :  { %v807_v51 = vpack.c.bf16 %v806_v50, %v806_v50  ;;  %1861 = vmatmul.mubr.bf16.vlgmr.msra.gmra.mrb[12].mxu1 %v735_v49 }
 0xb79   :  { %1885 = vmatpush3.bf16.msra.mxu1 %v2542_v25  ;;  %1900 = vmatprep.mubr.msk.bf16.mxu1 %vm2384_vm0, %v2383_v0 }
 0xb7a   :  { %1881 = vmatmul.mubr.bf16.vlgmr.msra.gmra.mrb[16].mxu0 %v807_v51  ;;  %1886 = vmatprep.subr.bf16.mxu1 %v2383_v0 }
 0xb7b   :  { %1905 = vmatpush3.bf16.msra.mxu0 %v2487_v1  ;;  %1920 = vmatprep.mubr.msk.bf16.mxu0 %vm2384_vm0, %v2383_v0 }
 0xb7c   :  { %1906 = vmatprep.subr.bf16.mxu0 %v2383_v0 }
 0xb7d   :  { %1887 = vmatpush3.bf16.msra.mxu1 %v2545_v26 }
 0xb7e   :  { %1888 = vmatprep.subr.bf16.mxu1 %v2383_v0 }
 0xb7f   :  { %1907 = vmatpush3.bf16.msra.mxu0 %v2490_v2 }
 0xb80   :  { %1908 = vmatprep.subr.bf16.mxu0 %v2383_v0 }
 0xb81   :  { %1889 = vmatpush3.bf16.msra.mxu1 %v2549_v27 }
 0xb82   :  { %1890 = vmatprep.subr.bf16.mxu1 %v2383_v0 }
 0xb83   :  { %1909 = vmatpush3.bf16.msra.mxu0 %v2494_v3 }
 0xb84   :  { %1910 = vmatprep.subr.bf16.mxu0 %v2383_v0 }
 0xb85   :  { %1891 = vmatpush3.bf16.msra.mxu1 %v2553_v29 }
 0xb86   :  { %1892 = vmatprep.subr.bf16.mxu1 %v2383_v0 }
 0xb87   :  { %1911 = vmatpush3.bf16.msra.mxu0 %v2497_v4 }
 0xb88   :  { %1912 = vmatprep.subr.bf16.mxu0 %v2383_v0 }
 0xb89   :  { %1893 = vmatpush3.bf16.msra.mxu1 %v2558_v30 }
 0xb8a   :  { %1894 = vmatprep.subr.bf16.mxu1 %v2383_v0 }
 0xb8b   :  { %1913 = vmatpush3.bf16.msra.mxu0 %v2502_v5 }
 0xb8c   :  { %1914 = vmatprep.subr.bf16.mxu0 %v2383_v0 }
 0xb8d   :  { %1895 = vmatpush3.bf16.msra.mxu1 %v2562_v31 }
 0xb8e   :  { %1896 = vmatprep.subr.bf16.mxu1 %v2383_v0 }
 0xb8f   :  { %1915 = vmatpush3.bf16.msra.mxu0 %v2506_v6 }
 0xb90   :  { %1916 = vmatprep.subr.bf16.mxu0 %v2383_v0 }
 0xb91   :  { %1897 = vmatpush3.bf16.msra.mxu1 %v2566_v32 }
 0xb92   :  { %1898 = vmatprep.subr.bf16.mxu1 %v2383_v0 }
 0xb93   :  { %1917 = vmatpush3.bf16.msra.mxu0 %v2510_v7 }
 0xb94   :  { %1918 = vmatprep.subr.bf16.mxu0 %v2383_v0 }
 0xb95   :  { %1899 = vmatpush3.bf16.msra.mxu1 %v2571_v33 }
 0xb96   :  { %1924 = vmatprep.subr.bf16.mxu1 %v2383_v0 }
 0xb97   :  { %1919 = vmatpush3.bf16.msra.mxu0 %v2514_v8 }
 0xb98   :  { %1944 = vmatprep.subr.bf16.mxu0 %v2383_v0 }
 0xc4b   :  { %v770_v1 = vpop.f32.mrb[12].mxu1 }
 0xc4c   :  { %2169 = vtanh.f32 %v770_v1  ;;  %v1862_v2 = vpop.f32.mrb[13].mxu1  ;;  %v1534_v55 = vmul.f32 -1.442695, %v770_v1 }
 0xc4d   :  { %v773_v3 = vpop.f32.mrb[14].mxu1  ;;  %v842_v4 = vpop.f32.mrb[16].mxu0 }
 0xc4e   :  { %v1863_v5 = vpop.f32.mrb[15].mxu1  ;;  %v1882_v6 = vpop.f32.mrb[17].mxu0  ;;  %2171 = vtanh.f32 %v842_v4  ;;  %v1535_v8 = vmul.f32 -1.442695, %v842_v4 }
 0xc4f   :  { %v845_v52 = vpop.f32.mrb[18].mxu0  ;;  %2173 = vpow2.f32 %v1534_v55 }
 0xc50   :  { %v1883_v7 = vpop.f32.mrb[19].mxu0  ;;  %2175 = vpow2.f32 %v1535_v8 }
 0xc56   :  { %v2170_v53 = vpop.eup %2169 }
 0xc57   :  { %785 = vrot.lane.b32.xlu0 %v2170_v53, %s2376_s25 }
 0xc58   :  { %v2172_v54 = vpop.eup %2171 }
 0xc59   :  { %857 = vrot.lane.b32.xlu1 %v2172_v54, %s2376_s25  ;;  %v2174_v56 = vpop.eup %2173 }
 0xc5a   :  { %v2176_v57 = vpop.eup %2175  ;;  %v779_v58 = vadd.f32 1.0, %v2174_v56 }
 0xc5b   :  { %v851_v59 = vadd.f32 1.0, %v2176_v57 }
 0xc5c   :  { %2177 = vrcp.f32 %v779_v58 }
 0xc5d   :  { %2179 = vrcp.f32 %v851_v59 }
 0xc66   :  { %v2178_v60 = vpop.eup %2177 }
 0xc67   :  { %v2180_v63 = vpop.eup %2179  ;;  %v783_v11 = vmul.f32 %v2178_v60, %v2741_v34 }
 0xc68   :  { %v855_v14 = vmul.f32 %v2180_v63, %v2743_v35 }
 0xcc9   :  { %v786_v61 = vpop.permute.xlu0 %785 }
 0xcca   :  { %v788_v62 = vmul.f32 %v2178_v60, %v786_v61 }
 0xccb   :  { %v858_v9 = vpop.permute.xlu1 %857 }
 0xccc   :  { %790 = vrot.lane.b32.xlu0 %v788_v62, %s2385_s3  ;;  %v860_v10 = vmul.f32 %v2180_v63, %v858_v9 }
 0xcce   :  { %862 = vrot.lane.b32.xlu1 %v860_v10, %s2385_s3 }
 0xd3e   :  { %v791_v12 = vpop.permute.xlu0 %790 }
 0xd3f   :  { %v2798_v13 = vadd.f32 %v791_v12, %v783_v11 }
 0xd40   :  { %v863_v15 = vpop.permute.xlu1 %862 }
 0xd41   :  { %2181 = vtanh.f32 %v2798_v13  ;;  %v2802_v16 = vadd.f32 %v863_v15, %v855_v14 }
 0xd43   :  { %2183 = vtanh.f32 %v2802_v16 }
 0xd4b   :  { %v2182_v17 = vpop.eup %2181 }
 0xd4c   :  { %796 = vrot.lane.b32.xlu0 %v2182_v17, %s2376_s25 }
 0xd4d   :  { %v2184_v18 = vpop.eup %2183 }
 0xd4e   :  { %868 = vrot.lane.b32.xlu1 %v2184_v18, %s2376_s25 }
 0xdbe   :  { %v797_v22 = vpop.permute.xlu0 %796 }
 0xdbf   :  { %v799_v23 = vmul.f32 %v2178_v60, %v797_v22 }
 0xdc0   :  { %v869_v34 = vpop.permute.xlu1 %868 }
 0xdc1   :  { %873 = vrot.lane.b32.xlu0 %v799_v23, %s2385_s3  ;;  %v871_v24 = vmul.f32 %v2180_v63, %v869_v34 }
 0xdc3   :  { %879 = vrot.lane.b32.xlu1 %v871_v24, %s2386_s1 }
 0xdc5   :  { %952 = vrot.lane.b32.xlu0 %v871_v24, %s2385_s3  ;;  %v1101_v24 = vld [vmem:[#allocation2 + $0x30] sm:$0xff] }
 0xe33   :  { %v874_v35 = vpop.permute.xlu0 %873 }
 0xe34   :  { %v876_v21 = vsel %vm354_vm2, %v874_v35, 0.0 }
 0xe35   :  { %v877_v36 = vadd.f32 %v2578_v40, %v876_v21  ;;  %v880_v37 = vpop.permute.xlu1 %879 }
 0xe36   :  { %v882_v19 = vsel %vm215_vm3, 0.0, %v880_v37 }
 0xe37   :  { %v953_v38 = vpop.permute.xlu0 %952  ;;  %v883_v28 = vsel %vm217_vm4, %v882_v19, 0.0 }
 0xe38   :  { %v955_v39 = vsel %vm354_vm2, %v953_v38, 0.0  ;;  %v884_v41 = vadd.f32 %v883_v28, %v877_v36  ;;  %v2889_v38 = vld [vmem:[#allocation7] sm:$0xff]   ;;  %v2899_v28 = vld [vmem:[#allocation7 + $0x8] sm:$0xff]  }
 0xe39   :  { %v956_v42 = vadd.f32 %v955_v39, %v951_v20  ;;  %v2905_v39 = vld [vmem:[#allocation7 + $0x10] sm:$0xff]  }
 0xe3a   :  { %v885_v43 = vpack.c.bf16 %v884_v41, %v884_v41  ;;  %v2911_v41 = vld [vmem:[#allocation7 + $0x18] sm:$0xff]  }
 0xe3b   :  { %v957_v44 = vpack.c.bf16 %v956_v42, %v956_v42  ;;  %v2917_v42 = vld [vmem:[#allocation7 + $0x20] sm:$0xff]  }
 0xe3c   :  { %1901 = vmatmul.mubr.bf16.vlgmr.msra.gmra.mrb[16].mxu1 %v885_v43  ;;  %v2923_v43 = vld [vmem:[#allocation7 + $0x28] sm:$0xff]  }
 0xe3d   :  { %1921 = vmatmul.mubr.bf16.vlgmr.msra.gmra.mrb[20].mxu0 %v957_v44  ;;  %1925 = vmatpush3.bf16.msra.mxu1 %v2542_v25  ;;  %v2832_v25 = vld [vmem:[#allocation5 + $0x10] sm:$0xff]  }
 0xe3e   :  { %1945 = vmatpush3.bf16.msra.mxu0 %v2816_v45  ;;  %1926 = vmatprep.subr.bf16.mxu1 %v2383_v0  ;;  %v2929_v44 = vld [vmem:[#allocation7 + $0x30] sm:$0xff]  }
 0xe3f   :  { %1946 = vmatprep.subr.bf16.mxu0 %v2383_v0  ;;  %1940 = vmatprep.mubr.msk.bf16.mxu1 %vm2384_vm0, %v2383_v0 }
 0xe40   :  { %1960 = vmatprep.mubr.msk.bf16.mxu0 %vm2384_vm0, %v2383_v0 }
 0xe41   :  { %1927 = vmatpush3.bf16.msra.mxu1 %v2545_v26  ;;  %v2838_v26 = vld [vmem:[#allocation5 + $0x18] sm:$0xff]  }
 0xe42   :  { %1947 = vmatpush3.bf16.msra.mxu0 %v2826_v46  ;;  %1928 = vmatprep.subr.bf16.mxu1 %v2383_v0 }
 0xe43   :  { %1948 = vmatprep.subr.bf16.mxu0 %v2383_v0 }
 0xe45   :  { %1929 = vmatpush3.bf16.msra.mxu1 %v2549_v27  ;;  %v2844_v27 = vld [vmem:[#allocation5 + $0x20] sm:$0xff]  }
 0xe46   :  { %1949 = vmatpush3.bf16.msra.mxu0 %v2832_v25  ;;  %1930 = vmatprep.subr.bf16.mxu1 %v2383_v0 }
 0xe47   :  { %1950 = vmatprep.subr.bf16.mxu0 %v2383_v0 }
 0xe49   :  { %1931 = vmatpush3.bf16.msra.mxu1 %v2553_v29  ;;  %v2850_v29 = vld [vmem:[#allocation5 + $0x28] sm:$0xff]  }
 0xe4a   :  { %1951 = vmatpush3.bf16.msra.mxu0 %v2838_v26  ;;  %1932 = vmatprep.subr.bf16.mxu1 %v2383_v0 }
 0xe4b   :  { %1952 = vmatprep.subr.bf16.mxu0 %v2383_v0 }
 0xe4d   :  { %1933 = vmatpush3.bf16.msra.mxu1 %v2558_v30  ;;  %v2856_v30 = vld [vmem:[#allocation5 + $0x30] sm:$0xff]  }
 0xe4e   :  { %1953 = vmatpush3.bf16.msra.mxu0 %v2844_v27  ;;  %1934 = vmatprep.subr.bf16.mxu1 %v2383_v0 }
 0xe4f   :  { %1954 = vmatprep.subr.bf16.mxu0 %v2383_v0 }
 0xe51   :  { %1935 = vmatpush3.bf16.msra.mxu1 %v2562_v31  ;;  %v2862_v31 = vld [vmem:[#allocation5 + $0x38] sm:$0xff]  }
 0xe52   :  { %1955 = vmatpush3.bf16.msra.mxu0 %v2850_v29  ;;  %1936 = vmatprep.subr.bf16.mxu1 %v2383_v0 }
 0xe53   :  { %1956 = vmatprep.subr.bf16.mxu0 %v2383_v0 }
 0xe55   :  { %1937 = vmatpush3.bf16.msra.mxu1 %v2566_v32 }
 0xe56   :  { %1957 = vmatpush3.bf16.msra.mxu0 %v2856_v30  ;;  %1938 = vmatprep.subr.bf16.mxu1 %v2383_v0 }
 0xe57   :  { %1958 = vmatprep.subr.bf16.mxu0 %v2383_v0 }
 0xe59   :  { %1939 = vmatpush3.bf16.msra.mxu1 %v2571_v33 }
 0xe5a   :  { %1959 = vmatpush3.bf16.msra.mxu0 %v2862_v31  ;;  %1964 = vmatprep.subr.bf16.mxu1 %v2383_v0 }
 0xe5b   :  { %1984 = vmatprep.subr.bf16.mxu0 %v2383_v0 }
 0xf0f   :  { %v920_v47 = vpop.f32.mrb[16].mxu1 }
 0xf10   :  { %v992_v32 = vpop.f32.mrb[20].mxu0  ;;  %2185 = vtanh.f32 %v920_v47  ;;  %v1902_v48 = vpop.f32.mrb[17].mxu1  ;;  %v1536_v4 = vmul.f32 -1.442695, %v920_v47 }
 0xf11   :  { %v1922_v49 = vpop.f32.mrb[21].mxu0  ;;  %2187 = vtanh.f32 %v992_v32  ;;  %v923_v50 = vpop.f32.mrb[18].mxu1  ;;  %v1537_v5 = vmul.f32 -1.442695, %v992_v32 }
 0xf12   :  { %v995_v51 = vpop.f32.mrb[22].mxu0  ;;  %v1903_v1 = vpop.f32.mrb[19].mxu1  ;;  %2189 = vpow2.f32 %v1536_v4 }
 0xf13   :  { %v1923_v2 = vpop.f32.mrb[23].mxu0  ;;  %2191 = vpow2.f32 %v1537_v5 }
 0xf1a   :  { %v2186_v3 = vpop.eup %2185 }
 0xf1b   :  { %v2188_v33 = vpop.eup %2187  ;;  %935 = vrot.lane.b32.xlu1 %v2186_v3, %s2376_s25 }
 0xf1c   :  { %1007 = vrot.lane.b32.xlu0 %v2188_v33, %s2376_s25  ;;  %v2190_v6 = vpop.eup %2189 }
 0xf1d   :  { %v2192_v52 = vpop.eup %2191  ;;  %v929_v7 = vadd.f32 1.0, %v2190_v6 }
 0xf1e   :  { %v1001_v53 = vadd.f32 1.0, %v2192_v52 }
 0xf1f   :  { %2193 = vrcp.f32 %v929_v7 }
 0xf20   :  { %2195 = vrcp.f32 %v1001_v53 }
 0xf29   :  { %v2194_v54 = vpop.eup %2193 }
 0xf2a   :  { %v2196_v8 = vpop.eup %2195  ;;  %v933_v59 = vmul.f32 %v2194_v54, %v2798_v13 }
 0xf2b   :  { %v1005_v61 = vmul.f32 %v2196_v8, %v2802_v16 }
 0xf8d   :  { %v936_v55 = vpop.permute.xlu1 %935 }
 0xf8e   :  { %v938_v56 = vmul.f32 %v2194_v54, %v936_v55  ;;  %v1008_v57 = vpop.permute.xlu0 %1007 }
 0xf8f   :  { %v1010_v58 = vmul.f32 %v2196_v8, %v1008_v57 }
 0xf90   :  { %940 = vrot.lane.b32.xlu1 %v938_v56, %s2385_s3 }
 0xf91   :  { %1012 = vrot.lane.b32.xlu0 %v1010_v58, %s2385_s3 }
0x1002   :  { %v941_v60 = vpop.permute.xlu1 %940 }
0x1003   :  { %v2873_v62 = vadd.f32 %v941_v60, %v933_v59  ;;  %v1013_v63 = vpop.permute.xlu0 %1012 }
0x1004   :  { %v2875_v9 = vadd.f32 %v1013_v63, %v1005_v61 }
0x1005   :  { %2197 = vtanh.f32 %v2873_v62 }
0x1006   :  { %2199 = vtanh.f32 %v2875_v9 }
0x100f   :  { %v2198_v10 = vpop.eup %2197 }
0x1010   :  { %v2200_v11 = vpop.eup %2199  ;;  %946 = vrot.lane.b32.xlu1 %v2198_v10, %s2376_s25 }
0x1011   :  { %1018 = vrot.lane.b32.xlu0 %v2200_v11, %s2376_s25 }
0x1082   :  { %v947_v12 = vpop.permute.xlu1 %946 }
0x1083   :  { %v949_v13 = vmul.f32 %v2194_v54, %v947_v12  ;;  %v1019_v14 = vpop.permute.xlu0 %1018 }
0x1084   :  { %v1021_v15 = vmul.f32 %v2196_v8, %v1019_v14 }
0x1085   :  { %1023 = vrot.lane.b32.xlu1 %v949_v13, %s2385_s3  ;;  %v1251_v13 = vld [vmem:[#allocation2 + $0x38] sm:$0xff] }
0x1086   :  { %1029 = vrot.lane.b32.xlu0 %v1021_v15, %s2386_s1 }
0x1089   :  { %1102 = vrot.lane.b32.xlu1 %v1021_v15, %s2385_s3 }
0x10f7   :  { %v1024_v16 = vpop.permute.xlu1 %1023 }
0x10f8   :  { %v1026_v17 = vsel %vm354_vm2, %v1024_v16, 0.0  ;;  %v1030_v18 = vpop.permute.xlu0 %1029 }
0x10f9   :  { %v1027_v22 = vadd.f32 %v2578_v40, %v1026_v17  ;;  %v1032_v23 = vsel %vm215_vm3, 0.0, %v1030_v18 }
0x10fa   :  { %v1033_v34 = vsel %vm217_vm4, %v1032_v23, 0.0 }
0x10fb   :  { %v1034_v35 = vadd.f32 %v1033_v34, %v1027_v22  ;;  %v1103_v21 = vpop.permute.xlu1 %1102 }
0x10fc   :  { %v1105_v36 = vsel %vm354_vm2, %v1103_v21, 0.0 }
0x10fd   :  { %v1035_v37 = vpack.c.bf16 %v1034_v35, %v1034_v35  ;;  %v1106_v20 = vadd.f32 %v1105_v36, %v1101_v24 }
0x10ff   :  { %v1107_v19 = vpack.c.bf16 %v1106_v20, %v1106_v20  ;;  %1941 = vmatmul.mubr.bf16.vlgmr.msra.gmra.mrb[20].mxu1 %v1035_v37 }
0x1100   :  { %1965 = vmatpush3.bf16.msra.mxu1 %v2889_v38  ;;  %1980 = vmatprep.mubr.msk.bf16.mxu1 %vm2384_vm0, %v2383_v0 }
0x1101   :  { %1961 = vmatmul.mubr.bf16.vlgmr.msra.gmra.mrb[24].mxu0 %v1107_v19  ;;  %1966 = vmatprep.subr.bf16.mxu1 %v2383_v0 }
0x1102   :  { %1985 = vmatpush3.bf16.msra.mxu0 %v2816_v45  ;;  %2000 = vmatprep.mubr.msk.bf16.mxu0 %vm2384_vm0, %v2383_v0  ;;  %v2935_v45 = vld [vmem:[#allocation7 + $0x38] sm:$0xff]  }
0x1103   :  { %1986 = vmatprep.subr.bf16.mxu0 %v2383_v0 }
0x1104   :  { %1967 = vmatpush3.bf16.msra.mxu1 %v2899_v28 }
0x1105   :  { %1968 = vmatprep.subr.bf16.mxu1 %v2383_v0 }
0x1106   :  { %1987 = vmatpush3.bf16.msra.mxu0 %v2826_v46 }
0x1107   :  { %1988 = vmatprep.subr.bf16.mxu0 %v2383_v0 }
0x1108   :  { %1969 = vmatpush3.bf16.msra.mxu1 %v2905_v39 }
0x1109   :  { %1970 = vmatprep.subr.bf16.mxu1 %v2383_v0 }
0x110a   :  { %1989 = vmatpush3.bf16.msra.mxu0 %v2832_v25 }
0x110b   :  { %1990 = vmatprep.subr.bf16.mxu0 %v2383_v0 }
0x110c   :  { %1971 = vmatpush3.bf16.msra.mxu1 %v2911_v41 }
0x110d   :  { %1972 = vmatprep.subr.bf16.mxu1 %v2383_v0 }
0x110e   :  { %1991 = vmatpush3.bf16.msra.mxu0 %v2838_v26 }
0x110f   :  { %1992 = vmatprep.subr.bf16.mxu0 %v2383_v0 }
0x1110   :  { %1973 = vmatpush3.bf16.msra.mxu1 %v2917_v42 }
0x1111   :  { %1974 = vmatprep.subr.bf16.mxu1 %v2383_v0 }
0x1112   :  { %1993 = vmatpush3.bf16.msra.mxu0 %v2844_v27 }
0x1113   :  { %1994 = vmatprep.subr.bf16.mxu0 %v2383_v0 }
0x1114   :  { %1975 = vmatpush3.bf16.msra.mxu1 %v2923_v43 }
0x1115   :  { %1976 = vmatprep.subr.bf16.mxu1 %v2383_v0 }
0x1116   :  { %1995 = vmatpush3.bf16.msra.mxu0 %v2850_v29 }
0x1117   :  { %1996 = vmatprep.subr.bf16.mxu0 %v2383_v0 }
0x1118   :  { %1977 = vmatpush3.bf16.msra.mxu1 %v2929_v44 }
0x1119   :  { %1978 = vmatprep.subr.bf16.mxu1 %v2383_v0 }
0x111a   :  { %1997 = vmatpush3.bf16.msra.mxu0 %v2856_v30 }
0x111b   :  { %1998 = vmatprep.subr.bf16.mxu0 %v2383_v0 }
0x111c   :  { %1979 = vmatpush3.bf16.msra.mxu1 %v2935_v45 }
0x111d   :  { %2004 = vmatprep.subr.bf16.mxu1 %v2383_v0 }
0x111e   :  { %1999 = vmatpush3.bf16.msra.mxu0 %v2862_v31 }
0x11d2   :  { %v1070_v46 = vpop.f32.mrb[20].mxu1 }
0x11d3   :  { %2201 = vtanh.f32 %v1070_v46  ;;  %v1942_v25 = vpop.f32.mrb[21].mxu1  ;;  %v1538_v50 = vmul.f32 -1.442695, %v1070_v46 }
0x11d4   :  { %v1073_v26 = vpop.f32.mrb[22].mxu1  ;;  %v1142_v27 = vpop.f32.mrb[24].mxu0 }
0x11d5   :  { %v1943_v29 = vpop.f32.mrb[23].mxu1  ;;  %v1962_v47 = vpop.f32.mrb[25].mxu0  ;;  %2203 = vtanh.f32 %v1142_v27  ;;  %v1539_v51 = vmul.f32 -1.442695, %v1142_v27 }
0x11d6   :  { %v1145_v32 = vpop.f32.mrb[26].mxu0  ;;  %2205 = vpow2.f32 %v1538_v50 }
0x11d7   :  { %v1963_v30 = vpop.f32.mrb[27].mxu0  ;;  %2207 = vpow2.f32 %v1539_v51 }
0x11dd   :  { %v2202_v48 = vpop.eup %2201 }
0x11de   :  { %1085 = vrot.lane.b32.xlu0 %v2202_v48, %s2376_s25 }
0x11df   :  { %v2204_v49 = vpop.eup %2203 }
0x11e0   :  { %1157 = vrot.lane.b32.xlu1 %v2204_v49, %s2376_s25  ;;  %v2206_v31 = vpop.eup %2205 }
0x11e1   :  { %v2208_v1 = vpop.eup %2207  ;;  %v1079_v2 = vadd.f32 1.0, %v2206_v31 }
0x11e2   :  { %v1151_v3 = vadd.f32 1.0, %v2208_v1 }
0x11e3   :  { %2209 = vrcp.f32 %v1079_v2 }
0x11e4   :  { %2211 = vrcp.f32 %v1151_v3 }
0x11ed   :  { %v2210_v33 = vpop.eup %2209 }
0x11ee   :  { %v2212_v6 = vpop.eup %2211  ;;  %v1083_v53 = vmul.f32 %v2210_v33, %v2873_v62 }
0x11ef   :  { %v1155_v8 = vmul.f32 %v2212_v6, %v2875_v9 }
0x1250   :  { %v1086_v4 = vpop.permute.xlu0 %1085 }
0x1251   :  { %v1088_v5 = vmul.f32 %v2210_v33, %v1086_v4 }
0x1252   :  { %v1158_v52 = vpop.permute.xlu1 %1157 }
0x1253   :  { %1090 = vrot.lane.b32.xlu0 %v1088_v5, %s2385_s3  ;;  %v1160_v7 = vmul.f32 %v2212_v6, %v1158_v52 }
0x1255   :  { %1162 = vrot.lane.b32.xlu1 %v1160_v7, %s2385_s3 }
0x12c5   :  { %v1091_v54 = vpop.permute.xlu0 %1090 }
0x12c6   :  { %v2945_v55 = vadd.f32 %v1091_v54, %v1083_v53 }
0x12c7   :  { %v1163_v56 = vpop.permute.xlu1 %1162 }
0x12c8   :  { %2213 = vtanh.f32 %v2945_v55  ;;  %v2949_v57 = vadd.f32 %v1163_v56, %v1155_v8 }
0x12ca   :  { %2215 = vtanh.f32 %v2949_v57 }
0x12d2   :  { %v2214_v58 = vpop.eup %2213 }
0x12d3   :  { %1096 = vrot.lane.b32.xlu0 %v2214_v58, %s2376_s25 }
0x12d4   :  { %v2216_v59 = vpop.eup %2215 }
0x12d5   :  { %1168 = vrot.lane.b32.xlu1 %v2216_v59, %s2376_s25 }
0x1345   :  { %v1097_v60 = vpop.permute.xlu0 %1096 }
0x1346   :  { %v1099_v61 = vmul.f32 %v2210_v33, %v1097_v60 }
0x1347   :  { %v1169_v62 = vpop.permute.xlu1 %1168 }
0x1348   :  { %1173 = vrot.lane.b32.xlu0 %v1099_v61, %s2385_s3  ;;  %v1171_v63 = vmul.f32 %v2212_v6, %v1169_v62 }
0x134a   :  { %1179 = vrot.lane.b32.xlu1 %v1171_v63, %s2386_s1 }
0x134c   :  { %1252 = vrot.lane.b32.xlu0 %v1171_v63, %s2385_s3 }
0x13ba   :  { %v1174_v9 = vpop.permute.xlu0 %1173 }
0x13bb   :  { %v1176_v10 = vsel %vm354_vm2, %v1174_v9, 0.0 }
0x13bc   :  { %v1177_v11 = vadd.f32 %v2578_v40, %v1176_v10  ;;  %v1180_v12 = vpop.permute.xlu1 %1179 }
0x13bd   :  { %v1182_v14 = vsel %vm215_vm3, 0.0, %v1180_v12 }
0x13be   :  { %v1253_v15 = vpop.permute.xlu0 %1252  ;;  %v1183_v16 = vsel %vm217_vm4, %v1182_v14, 0.0 }
0x13bf   :  { %v1255_v17 = vsel %vm354_vm2, %v1253_v15, 0.0  ;;  %v1184_v18 = vadd.f32 %v1183_v16, %v1177_v11  ;;  %v1406_v15 = vld [vmem:[#allocation8] sm:$0xff]  ;;  %v1407_v16 = vld [vmem:[#allocation8 + $0x8] sm:$0xff] }
0x13c0   :  { %v1256_v22 = vadd.f32 %v1255_v17, %v1251_v13  ;;  %v1408_v17 = vld [vmem:[#allocation8 + $0x10] sm:$0xff] }
0x13c1   :  { %v1185_v23 = vpack.c.bf16 %v1184_v18, %v1184_v18  ;;  %v2387_v18 = vmov 0.0|0.0  }
0x13c2   :  { %v1257_v34 = vpack.c.bf16 %v1256_v22, %v1256_v22  ;;  %2059 = vmatprep.subr.bf16.mxu0 %v2387_v18  ;;  %v2060_v22 = vpack.c.bf16 %v1407_v16, %v1406_v15 }
0x13c3   :  { %1981 = vmatmul.mubr.bf16.vlgmr.msra.gmra.mrb[24].mxu1 %v1185_v23  ;;  %v1409_v23 = vld [vmem:[#allocation8 + $0x18] sm:$0xff] }
0x13c4   :  { %2001 = vmatmul.mubr.bf16.vlgmr.msra.gmra.mrb[28].mxu0 %v1257_v34  ;;  %2005 = vmatpush3.bf16.msra.mxu1 %v2889_v38  ;;  %v2063_v34 = vpack.c.bf16 %v1409_v23, %v1408_v17 }
0x13c5   :  { %2020 = vmatprep.mubr.msk.bf16.mxu1 %vm2384_vm0, %v2383_v0  ;;  %2006 = vmatprep.subr.bf16.mxu1 %v2383_v0 }
0x13c6   :  { %2056 = vmatprep.mubr.msk.f32.mxu0 %vm2384_vm0, %v2383_v0  ;;  %2061 = vmatpush3.bf16.msra.mxu0 %v2060_v22 }
0x13c7   :  { %2062 = vmatprep.subr.bf16.mxu0 %v2387_v18 }
0x13c8   :  { %2007 = vmatpush3.bf16.msra.mxu1 %v2899_v28 }
0x13c9   :  { %2008 = vmatprep.subr.bf16.mxu1 %v2383_v0 }
0x13ca   :  { %2064 = vmatpush3.bf16.msra.mxu0 %v2063_v34 }
0x13cb   :  { %2065 = vmatprep.subr.bf16.mxu0 %v2387_v18 }
0x13cc   :  { %2009 = vmatpush3.bf16.msra.mxu1 %v2905_v39 }
0x13cd   :  { %2010 = vmatprep.subr.bf16.mxu1 %v2383_v0 }
0x13d0   :  { %2011 = vmatpush3.bf16.msra.mxu1 %v2911_v41 }
0x13d1   :  { %2012 = vmatprep.subr.bf16.mxu1 %v2383_v0 }
0x13d4   :  { %2013 = vmatpush3.bf16.msra.mxu1 %v2917_v42 }
0x13d5   :  { %2014 = vmatprep.subr.bf16.mxu1 %v2383_v0 }
0x13d8   :  { %2015 = vmatpush3.bf16.msra.mxu1 %v2923_v43 }
0x13d9   :  { %2016 = vmatprep.subr.bf16.mxu1 %v2383_v0 }
0x13dc   :  { %2017 = vmatpush3.bf16.msra.mxu1 %v2929_v44 }
0x13dd   :  { %2018 = vmatprep.subr.bf16.mxu1 %v2383_v0 }
0x13e0   :  { %2019 = vmatpush3.bf16.msra.mxu1 %v2935_v45 }
0x1496   :  { %v1220_v24 = vpop.f32.mrb[24].mxu1 }
0x1497   :  { %v1292_v35 = vpop.f32.mrb[28].mxu0  ;;  %2217 = vtanh.f32 %v1220_v24  ;;  %v1982_v21 = vpop.f32.mrb[25].mxu1  ;;  %v1540_v41 = vmul.f32 -1.442695, %v1220_v24  ;;  %v1410_v24 = vld [vmem:[#allocation8 + $0x20] sm:$0xff] }
0x1498   :  { %v2002_v36 = vpop.f32.mrb[29].mxu0  ;;  %2219 = vtanh.f32 %v1292_v35  ;;  %v1223_v37 = vpop.f32.mrb[26].mxu1  ;;  %v1541_v0 = vmul.f32 -1.442695, %v1292_v35  ;;  %v1411_v35 = vld [vmem:[#allocation8 + $0x28] sm:$0xff] }
0x1499   :  { %v1295_v20 = vpop.f32.mrb[30].mxu0  ;;  %v1983_v19 = vpop.f32.mrb[27].mxu1  ;;  %2221 = vpow2.f32 %v1540_v41  ;;  %v2066_v21 = vpack.c.bf16 %v1411_v35, %v1410_v24  ;;  %v1412_v36 = vld [vmem:[#allocation8 + $0x30] sm:$0xff]  ;;  %v1413_v37 = vld [vmem:[#allocation8 + $0x38] sm:$0xff] }
0x149a   :  { %v2003_v38 = vpop.f32.mrb[31].mxu0  ;;  %2223 = vpow2.f32 %v1541_v0  ;;  %v2069_v19 = vpack.c.bf16 %v1413_v37, %v1412_v36  ;;  %v1416_v41 = vld [vmem:[#allocation8 + $0x50] sm:$0xff]  ;;  %v1417_v0 = vld [vmem:[#allocation8 + $0x58] sm:$0xff] }
0x149b   :  { %2067 = vmatpush3.bf16.msra.mxu0 %v2066_v21  ;;  %v1414_v38 = vld [vmem:[#allocation8 + $0x40] sm:$0xff] }
0x149c   :  { %2068 = vmatprep.subr.bf16.mxu0 %v2387_v18 }
0x149f   :  { %2070 = vmatpush3.bf16.msra.mxu0 %v2069_v19 }
0x14a0   :  { %2071 = vmatprep.subr.bf16.mxu0 %v2387_v18 }
0x14a1   :  { %v2218_v28 = vpop.eup %2217 }
0x14a2   :  { %v2220_v39 = vpop.eup %2219  ;;  %1235 = vrot.lane.b32.xlu1 %v2218_v28, %s2376_s25  ;;  %v1415_v28 = vld [vmem:[#allocation8 + $0x48] sm:$0xff] }
0x14a3   :  { %1307 = vrot.lane.b32.xlu0 %v2220_v39, %s2376_s25  ;;  %v2222_v42 = vpop.eup %2221  ;;  %v2072_v39 = vpack.c.bf16 %v1415_v28, %v1414_v38 }
0x14a4   :  { %v2224_v43 = vpop.eup %2223  ;;  %v1229_v44 = vadd.f32 1.0, %v2222_v42  ;;  %v2075_v42 = vpack.c.bf16 %v1417_v0, %v1416_v41 }
0x14a5   :  { %v1301_v45 = vadd.f32 1.0, %v2224_v43  ;;  %2073 = vmatpush3.bf16.msra.mxu0 %v2072_v39  ;;  %v1418_v43 = vld [vmem:[#allocation8 + $0x60] sm:$0xff] }
0x14a6   :  { %2225 = vrcp.f32 %v1229_v44  ;;  %2074 = vmatprep.subr.bf16.mxu0 %v2387_v18  ;;  %v1419_v44 = vld [vmem:[#allocation8 + $0x68] sm:$0xff] }
0x14a7   :  { %2227 = vrcp.f32 %v1301_v45  ;;  %v2078_v45 = vpack.c.bf16 %v1419_v44, %v1418_v43 }
0x14a9   :  { %2076 = vmatpush3.bf16.msra.mxu0 %v2075_v42 }
0x14aa   :  { %2077 = vmatprep.subr.bf16.mxu0 %v2387_v18 }
0x14ad   :  { %2079 = vmatpush3.bf16.msra.mxu0 %v2078_v45 }
0x14ae   :  { %2080 = vmatprep.subr.bf16.mxu0 %v2387_v18 }
0x14b0   :  { %v2226_v46 = vpop.eup %2225 }
0x14b1   :  { %v2228_v26 = vpop.eup %2227  ;;  %v1233_v32 = vmul.f32 %v2226_v46, %v2945_v55 }
0x14b2   :  { %v1305_v48 = vmul.f32 %v2228_v26, %v2949_v57 }
0x1514   :  { %v1236_v25 = vpop.permute.xlu1 %1235 }
0x1515   :  { %v1238_v27 = vmul.f32 %v2226_v46, %v1236_v25  ;;  %v1308_v29 = vpop.permute.xlu0 %1307  ;;  %v1421_v25 = vld [vmem:[#allocation8 + $0x78] sm:$0xff] }
0x1516   :  { %v1310_v47 = vmul.f32 %v2228_v26, %v1308_v29 }
0x1517   :  { %1240 = vrot.lane.b32.xlu1 %v1238_v27, %s2385_s3 }
0x1518   :  { %1312 = vrot.lane.b32.xlu0 %v1310_v47, %s2385_s3 }
0x1589   :  { %v1241_v30 = vpop.permute.xlu1 %1240 }
0x158a   :  { %v1243_v49 = vadd.f32 %v1241_v30, %v1233_v32  ;;  %v1313_v50 = vpop.permute.xlu0 %1312 }
0x158b   :  { %v1315_v51 = vadd.f32 %v1313_v50, %v1305_v48 }
0x158c   :  { %2229 = vtanh.f32 %v1243_v49 }
0x158d   :  { %2231 = vtanh.f32 %v1315_v51 }
0x1596   :  { %v2230_v31 = vpop.eup %2229 }
0x1597   :  { %v2232_v1 = vpop.eup %2231  ;;  %1246 = vrot.lane.b32.xlu1 %v2230_v31, %s2376_s25 }
0x1598   :  { %1318 = vrot.lane.b32.xlu0 %v2232_v1, %s2376_s25 }
0x1609   :  { %v1247_v2 = vpop.permute.xlu1 %1246 }
0x160a   :  { %v1249_v3 = vmul.f32 %v2226_v46, %v1247_v2  ;;  %v1319_v33 = vpop.permute.xlu0 %1318  ;;  %v1420_v46 = vld [vmem:[#allocation8 + $0x70] sm:$0xff] }
0x160b   :  { %v1321_v4 = vmul.f32 %v2228_v26, %v1319_v33  ;;  %v2081_v26 = vpack.c.bf16 %v1421_v25, %v1420_v46 }
0x160c   :  { %1323 = vrot.lane.b32.xlu1 %v1249_v3, %s2385_s3 }
0x160d   :  { %1329 = vrot.lane.b32.xlu0 %v1321_v4, %s2386_s1  ;;  %2082 = vmatpush3.bf16.msra.mxu0 %v2081_v26 }
0x167e   :  { %v1324_v5 = vpop.permute.xlu1 %1323 }
0x167f   :  { %v1326_v6 = vsel %vm354_vm2, %v1324_v5, 0.0  ;;  %v1330_v52 = vpop.permute.xlu0 %1329 }
0x1680   :  { %v1327_v7 = vadd.f32 %v2578_v40, %v1326_v6  ;;  %v1332_v53 = vsel %vm215_vm3, 0.0, %v1330_v52 }
0x1681   :  { %v1333_v54 = vsel %vm217_vm4, %v1332_v53, 0.0 }
0x1682   :  { %v1334_v55 = vadd.f32 %v1333_v54, %v1327_v7 }
0x1684   :  { %v1335_v8 = vpack.c.bf16 %v1334_v55, %v1334_v55 }
0x1686   :  { %2021 = vmatmul.mubr.bf16.vlgmr.msra.gmra.mrb[28].mxu1 %v1335_v8 }
0x1759   :  { %v1370_v56 = vpop.f32.mrb[28].mxu1 }
0x175a   :  { %2233 = vtanh.f32 %v1370_v56  ;;  %v2022_v57 = vpop.f32.mrb[29].mxu1  ;;  %v1542_v61 = vmul.f32 -1.442695, %v1370_v56 }
0x175b   :  { %v1373_v58 = vpop.f32.mrb[30].mxu1 }
0x175c   :  { %v2023_v59 = vpop.f32.mrb[31].mxu1  ;;  %2235 = vpow2.f32 %v1542_v61 }
0x1764   :  { %v2234_v60 = vpop.eup %2233 }
0x1765   :  { %1385 = vrot.lane.b32.xlu1 %v2234_v60, %s2376_s25 }
0x1766   :  { %v2236_v62 = vpop.eup %2235 }
0x1767   :  { %v1379_v63 = vadd.f32 1.0, %v2236_v62 }
0x1769   :  { %2237 = vrcp.f32 %v1379_v63 }
0x1773   :  { %v2238_v9 = vpop.eup %2237 }
0x1774   :  { %v1383_v12 = vmul.f32 %v2238_v9, %v1243_v49 }
0x17d7   :  { %v1386_v10 = vpop.permute.xlu1 %1385 }
0x17d8   :  { %v1388_v11 = vmul.f32 %v2238_v9, %v1386_v10 }
0x17da   :  { %1390 = vrot.lane.b32.xlu0 %v1388_v11, %s2385_s3 }
0x184c   :  { %v1391_v13 = vpop.permute.xlu0 %1390 }
0x184d   :  { %v1393_v14 = vadd.f32 %v1391_v13, %v1383_v12 }
0x184f   :  { %2239 = vtanh.f32 %v1393_v14 }
0x1859   :  { %v2240_v20 = vpop.eup %2239 }
0x185a   :  { %1396 = vrot.lane.b32.xlu1 %v2240_v20, %s2376_s25  ;;  %s2388_s25 = smov [#allocation10]  }
0x185b   :  { %s1499_s13 = sshll.u32 %s2388_s25, 4  ;;  %s1500_s13 = int_to_ptr.vmem [resolvable:$true] %s1499_s13 }
0x185c   :  { %s2345_s14 = scalar_lea.vmem %s1500_s13, 128  ;;  %p2350_p5 = scmp.lt.s32.totalorder %s1500_s13, %s1500_s13 }
0x185d   :  { %p2346_p4 = scmp.ne.s32.totalorder %s1500_s13, %s2345_s14  ;;  %p2351_p6 = scmp.lt.s32.totalorder %s2345_s14, %s2345_s14 }
0x185f   :  { %p2352_p7 = por %p2351_p6, %p2350_p5 }
0x1861   :  { %p2353_p8 = pnand %p2352_p7, %p2346_p4 }
0x18cc   :  { %v1397_v27 = vpop.permute.xlu1 %1396 }
0x18cd   :  { %v1399_v29 = vmul.f32 %v2238_v9, %v1397_v27 }
0x18cf   :  { %1401 = vrot.lane.b32.xlu0 %v1399_v29, %s2385_s3 }
0x1941   :  { %v1402_v47 = vpop.permute.xlu0 %1401 }
0x1942   :  { %v1404_v32 = vsel %vm354_vm2, %v1402_v47, 0.0 }
0x1943   :  { %v1405_v30 = vadd.f32 %v2578_v40, %v1404_v32 }
0x1945   :  { %2057 = vmatmul.mubr.f32.vlgmr.msra.gmra.mrb[32].mxu0 %v1405_v30 }
0x1a18   :  { %v1488_v48 = vpop.f32.mrb[32].mxu0 }
0x1a19   :  { %1492 = vst [vmem:[#allocation10] sm:$0xff] %v1488_v48  ;;  %v2058_v49 = vpop.f32.mrb[33].mxu0 }
0x1a1a   :  { %2356 = shalt.err (!%p2353_p8)
}
0x1a1b   :  { %s2357_s17 = scalar_lea.hbm %s3017_s4, 128 }
0x1a1c   :  { %p2358_p9 = scmp.ne.s32.totalorder %s3017_s4, %s2357_s17  ;;  %p2361_p10 = scmp.lt.u32.totalorder %s2357_s17, %s3017_s4 }
0x1a1e   :  { %p2363_p11 = pnand %p2361_p10, %p2358_p9 }
0x1a20   :  { %2366 = shalt.err (!%p2363_p11)
}
0x1a21   :  { %1502 = dma.vmem_to_hbm [thread:$0]  %s1500_s13, 128, %s3017_s4, [#allocation4]  }
0x1a22   :  { %2373 = dma.done.wait [#allocation4], 128  }
0x1a23   :  { %2374 = vsyncadd [#allocation4], 4294967168 }
0x1a24   :  { %1506 = vsyncpa [#allocation3], 1 }
0x1a25   :  { %1507 = vsyncpa [#allocation6], 1 }
0x1a26   :  { %1508 = vsyncpa [#allocation9], 1 }
0x1a27   :  { %1509 = vsyncpa [#allocation4], 1 }

</bundles_post_ra>
